<compile_context>
chip_gen: v5e
topology: v5e:2x2
jax: 0.10.0
libtpu: 0.0.40
codegen_flags: <defaults>
</compile_context>

<pallas_src>
import functools

import jax
import jax.numpy as jnp
from jax.experimental import pallas as pl
from jax.experimental.pallas import tpu as pltpu

# ---- model config (small, consistent with the module's forward) ----
SEQ_LEN = 8
BATCH = 4
BATCH_PAD = 8                       # pad batch to one full sublane group
INPUT_SIZE = 16
HIDDEN_SIZE = 32
NUM_STRIPES = 4
NUM_LAYERS = 2
STRIPE = HIDDEN_SIZE // NUM_STRIPES  # 8


def _striped_lstm_wavefront_kernel(x_ref, wih0_ref, wpack_ref, bias_ref,
                                   h0_ref, c0_ref,
                                   out_ref, hn_ref, cn_ref,
                                   *, seq_len, batch, hidden):
    T, B, H = seq_len, batch, hidden
    H2 = 2 * H

    # Hoisted input projection for all T (+1 tail) combined steps in a single
    # MXU matmul.  wih0 has zeros in the layer-1 gate columns and the bias row
    # carries b1 there, so row-block k of `proj` is the complete additive term
    # (layer-0: x_k@Wih0+b0, layer-1: b1) of combined step k.
    proj = jnp.dot(x_ref[...], wih0_ref[...],
                   preferred_element_type=jnp.float32) + bias_ref[...]

    wpack = wpack_ref[...]                       # (2H, 8H) packed weights
    h_state = h0_ref[...]                        # (B, 2H)  [h_l0 | h_l1]
    c_state = c0_ref[...]                        # (B, 2H)  [c_l0 | c_l1]

    # Lane mask selecting the layer-0 half of the concatenated state.
    l0_mask = jax.lax.broadcasted_iota(jnp.int32, (B, H2), 1) < H

    outs = []
    # Wavefront: combined step k runs layer-0 time step k and layer-1 time
    # step k-1 off the SAME start-of-step state, with one (B,2H)x(2H,8H) MXU
    # dot and one full-width sigmoid (tanh(g) = 2*sigmoid(2g)-1; the G columns
    # of the packed weights/bias were pre-scaled by 2 host-side).
    for k in range(T + 1):                       # T static -> fully unrolled
        gates = proj[k * B:(k + 1) * B, :] + jnp.dot(
            h_state, wpack, preferred_element_type=jnp.float32)   # (B, 8H)
        sig = jax.nn.sigmoid(gates)                               # 1 EUP op
        i_blk = sig[:, 0 * H2:1 * H2]            # each (B, 2H): [layer0|layer1]
        f_blk = sig[:, 1 * H2:2 * H2]
        g_blk = 2.0 * sig[:, 2 * H2:3 * H2] - 1.0
        o_blk = sig[:, 3 * H2:4 * H2]
        c_new = f_blk * c_state + i_blk * g_blk                   # (B, 2H)
        h_new = o_blk * jnp.tanh(c_new)
        if k == 0:                               # layer-1 step -1 doesn't exist
            c_state = jnp.where(l0_mask, c_new, c_state)
            h_state = jnp.where(l0_mask, h_new, h_state)
        elif k == T:                             # layer-0 step T doesn't exist
            c_state = jnp.where(l0_mask, c_state, c_new)
            h_state = jnp.where(l0_mask, h_state, h_new)
        else:
            c_state, h_state = c_new, h_new
        if k >= 1:
            outs.append(h_new[:, H:])            # layer-1 output at time k-1

    # Bulk, lane-dense stores, once at the end.
    out_ref[...] = jnp.concatenate(outs, axis=1)                  # (B, T*H)
    hn_ref[...] = h_state
    cn_ref[...] = c_state


# --------------------- host-side parameter packing ---------------------------
def _block_diag(blocks):
    n = len(blocks)
    rows = []
    for i, blk in enumerate(blocks):
        rows.append(jnp.concatenate(
            [blk if j == i else jnp.zeros_like(blk) for j in range(n)], axis=1))
    return jnp.concatenate(rows, axis=0)


def _fuse_layer(wih, whh, bias):
    """Per-stripe params -> per-gate fused matrices (gate order [i,f,g,o]).

    wih: (nS, D_in, 4S), whh: (nS, S, 4S), bias: (nS, 1, 4S)
    Returns lists of 4 per-gate matrices:
      ih[g]: (D_in, H) dense; hh[g]: (H, H) stripe-block-diagonal; b[g]: (1, H)
    with stripe order inside each gate matching the stripe layout of h/c.
    """
    nS = wih.shape[0]
    S = whh.shape[1]
    ih_g, hh_g, b_g = [], [], []
    for g in range(4):
        ih_g.append(jnp.concatenate(
            [wih[s, :, g * S:(g + 1) * S] for s in range(nS)], axis=1))
        hh_g.append(_block_diag(
            [whh[s, :, g * S:(g + 1) * S] for s in range(nS)]))
        b_g.append(jnp.concatenate(
            [bias[s, :, g * S:(g + 1) * S] for s in range(nS)], axis=1))
    return ih_g, hh_g, b_g


def _pack_params(params):
    """Wavefront-packed weights (runs once under jit).

    Column layout (width 8H): gate groups [I|F|G|O], each 2H wide, split
    [layer-0 H | layer-1 H].  G-group columns are pre-scaled by 2 so the kernel
    evaluates tanh(x) = 2*sigmoid(2x) - 1 with one full-width sigmoid.
      wih0_wide: (D_in, 8H)   x_t -> layer-0 gates (layer-1 columns zero)
      w_pack   : (2H,  8H)    [h_l0 ; h_l1] -> both layers' gates
      bias_wide: (1,   8H)    b0 in layer-0 columns, b1 in layer-1 columns
    """
    (wih0, whh0, b0), (wih1, whh1, b1) = params
    ih0, hh0, bg0 = _fuse_layer(wih0, whh0, b0)
    ih1, hh1, bg1 = _fuse_layer(wih1, whh1, b1)
    d_in = wih0.shape[1]
    H = NUM_STRIPES * whh0.shape[1]

    z_dH = jnp.zeros((d_in, H), jnp.float32)
    z_HH = jnp.zeros((H, H), jnp.float32)

    wih0_wide = jnp.concatenate(
        [jnp.concatenate([ih0[g], z_dH], axis=1) for g in range(4)], axis=1)
    top = jnp.concatenate(
        [jnp.concatenate([hh0[g], ih1[g]], axis=1) for g in range(4)], axis=1)
    bot = jnp.concatenate(
        [jnp.concatenate([z_HH, hh1[g]], axis=1) for g in range(4)], axis=1)
    w_pack = jnp.concatenate([top, bot], axis=0)
    bias_wide = jnp.concatenate(
        [jnp.concatenate([bg0[g], bg1[g]], axis=1) for g in range(4)], axis=1)

    g_scale = jnp.concatenate(
        [jnp.full((1, 2 * H), 2.0 if g == 2 else 1.0, jnp.float32)
         for g in range(4)], axis=1)
    return wih0_wide * g_scale, w_pack * g_scale, bias_wide * g_scale


# ------------------------------- wrapper --------------------------------------
@jax.jit
def striped_lstm_forward(x_seq, params):
    """Full StripedLSTM: NUM_LAYERS stacked StripedLSTMCell layers, dropout=0,
    zero-initialized hidden state.  x_seq: (T, B, D_in).
    Returns (out (T,B,H), (h_n (L,B,H), c_n (L,B,H)))."""
    T, B, d_in = x_seq.shape
    H = HIDDEN_SIZE
    BP = BATCH_PAD

    wih0_wide, w_pack, bias_wide = _pack_params(params)

    # Pad the batch to 8 sublanes and append one zero time block (drives the
    # trailing layer-1-only wavefront step; its additive term is just the bias).
    x_pad = jnp.zeros((T + 1, BP, d_in), jnp.float32).at[:T, :B, :].set(x_seq)
    x_flat = x_pad.reshape((T + 1) * BP, d_in)

    h0 = jnp.zeros((BP, 2 * H), jnp.float32)
    c0 = jnp.zeros((BP, 2 * H), jnp.float32)

    kernel = functools.partial(_striped_lstm_wavefront_kernel,
                               seq_len=T, batch=BP, hidden=H)

    def full_spec(shape):
        return pl.BlockSpec(shape, lambda i, _n=len(shape): (0,) * _n)

    out_wide, hn_cat, cn_cat = pl.pallas_call(
        kernel,
        out_shape=(
            jax.ShapeDtypeStruct((BP, T * H), jnp.float32),     # out, lane-dense
            jax.ShapeDtypeStruct((BP, 2 * H), jnp.float32),     # h_n  [l0 | l1]
            jax.ShapeDtypeStruct((BP, 2 * H), jnp.float32),     # c_n  [l0 | l1]
        ),
        grid=(1,),
        in_specs=[
            full_spec(((T + 1) * BP, d_in)),                    # x (flat, padded)
            full_spec((d_in, 8 * H)),                           # W_ih0 (wide)
            full_spec((2 * H, 8 * H)),                          # packed W
            full_spec((1, 8 * H)),                              # bias (wide)
            full_spec((BP, 2 * H)),                             # h0 cat
            full_spec((BP, 2 * H)),                             # c0 cat
        ],
        out_specs=(
            full_spec((BP, T * H)),
            full_spec((BP, 2 * H)),
            full_spec((BP, 2 * H)),
        ),
        compiler_params=pltpu.CompilerParams(
            dimension_semantics=("arbitrary",)),
    )(x_flat, wih0_wide, w_pack, bias_wide, h0, c0)

    out = out_wide.reshape(BP, T, H).transpose(1, 0, 2)[:, :B, :]
    h_n = jnp.stack([hn_cat[:B, :H], hn_cat[:B, H:]], axis=0)
    c_n = jnp.stack([cn_cat[:B, :H], cn_cat[:B, H:]], axis=0)
    return out, (h_n, c_n)


# ---------- pure-JAX reference (mirrors the PyTorch per-stripe semantics) ----
def reference_forward(x_seq, params):
    T, B, _ = x_seq.shape
    layer_in = x_seq
    h_n, c_n = [], []
    for (wih, whh, bias) in params:
        h = jnp.zeros((B, HIDDEN_SIZE), jnp.float32)
        c = jnp.zeros((B, HIDDEN_SIZE), jnp.float32)
        outs = []
        for t in range(T):
            x = layer_in[t]
            h_parts, c_parts = [], []
            for s in range(NUM_STRIPES):
                lo, hi = s * STRIPE, (s + 1) * STRIPE
                h_s, c_s = h[:, lo:hi], c[:, lo:hi]
                gates = x @ wih[s] + h_s @ whh[s] + bias[s]
                i_g = jax.nn.sigmoid(gates[:, 0 * STRIPE:1 * STRIPE])
                f_g = jax.nn.sigmoid(gates[:, 1 * STRIPE:2 * STRIPE])
                g_g = jnp.tanh(gates[:, 2 * STRIPE:3 * STRIPE])
                o_g = jax.nn.sigmoid(gates[:, 3 * STRIPE:4 * STRIPE])
                c_new = f_g * c_s + i_g * g_g
                h_parts.append(o_g * jnp.tanh(c_new))
                c_parts.append(c_new)
            h = jnp.concatenate(h_parts, axis=1)
            c = jnp.concatenate(c_parts, axis=1)
            outs.append(h)
        layer_in = jnp.stack(outs)
        h_n.append(h)
        c_n.append(c)
    return layer_in, (jnp.stack(h_n), jnp.stack(c_n))


def init_params(key):
    """Deterministic parameter init (uniform ~ PyTorch kaiming/uniform bounds).

    Per layer: wih (nS, D_in, 4S)  [already transposed: gates = x @ wih[s]],
               whh (nS, S, 4S), bias (nS, 1, 4S) = b_ih + b_hh combined.
    Gate column order within each stripe: [i | f | g | o], width S each.
    """
    params = []
    for layer in range(NUM_LAYERS):
        d_in = INPUT_SIZE if layer == 0 else HIDDEN_SIZE
        bound = 1.0 / jnp.sqrt(jnp.float32(d_in))
        key, k1, k2, k3 = jax.random.split(key, 4)
        wih = jax.random.uniform(k1, (NUM_STRIPES, d_in, 4 * STRIPE),
                                 jnp.float32, -bound, bound)
        whh = jax.random.uniform(k2, (NUM_STRIPES, STRIPE, 4 * STRIPE),
                                 jnp.float32, -bound, bound)
        bias = jax.random.uniform(k3, (NUM_STRIPES, 1, 4 * STRIPE),
                                  jnp.float32, -bound, bound)
        params.append((wih, whh, bias))
    return params


if __name__ == "__main__":
    key = jax.random.PRNGKey(0)
    key, kx = jax.random.split(key)
    x = jax.random.normal(kx, (SEQ_LEN, BATCH, INPUT_SIZE), jnp.float32)
    params = init_params(key)

    out, (h_n, c_n) = striped_lstm_forward(x, params)
    out = jax.block_until_ready(out)
    h_n = jax.block_until_ready(h_n)
    c_n = jax.block_until_ready(c_n)

    ref_out, (ref_h, ref_c) = reference_forward(x, params)

    assert out.shape == (SEQ_LEN, BATCH, HIDDEN_SIZE)
    assert h_n.shape == (NUM_LAYERS, BATCH, HIDDEN_SIZE)
    assert c_n.shape == (NUM_LAYERS, BATCH, HIDDEN_SIZE)
    assert jnp.allclose(out, ref_out, atol=1e-4, rtol=1e-4)
    assert jnp.allclose(h_n, ref_h, atol=1e-4, rtol=1e-4)
    assert jnp.allclose(c_n, ref_c, atol=1e-4, rtol=1e-4)

    print("KERNEL_OK")
</pallas_src>

<mosaic_0001>
module attributes {stable_mosaic.version = 11 : i64} {
  func.func @_striped_lstm_wavefront_kernel(%arg0: i32, %arg1: memref<72x16xf32, #tpu.memory_space<vmem>>, %arg2: memref<16x256xf32, #tpu.memory_space<vmem>>, %arg3: memref<64x256xf32, #tpu.memory_space<vmem>>, %arg4: memref<1x256xf32, #tpu.memory_space<vmem>>, %arg5: memref<8x64xf32, #tpu.memory_space<vmem>>, %arg6: memref<8x64xf32, #tpu.memory_space<vmem>>, %arg7: memref<8x256xf32, #tpu.memory_space<vmem>>, %arg8: memref<8x64xf32, #tpu.memory_space<vmem>>, %arg9: memref<8x64xf32, #tpu.memory_space<vmem>>) attributes {dimension_semantics = [#tpu.dimension_semantics<arbitrary>], iteration_bounds = array<i64: 1>, scalar_prefetch = 0 : i64, scratch_operands = 0 : i64, tpu.core_type = #tpu.core_type<tc>, window_params = [{pipeline_mode = #tpu.pipeline_mode<synchronous>, transform_indices = @transform_0, window_bounds = array<i64: 72, 16>}, {pipeline_mode = #tpu.pipeline_mode<synchronous>, transform_indices = @transform_1, window_bounds = array<i64: 16, 256>}, {pipeline_mode = #tpu.pipeline_mode<synchronous>, transform_indices = @transform_2, window_bounds = array<i64: 64, 256>}, {pipeline_mode = #tpu.pipeline_mode<synchronous>, transform_indices = @transform_3, window_bounds = array<i64: 1, 256>}, {pipeline_mode = #tpu.pipeline_mode<synchronous>, transform_indices = @transform_4, window_bounds = array<i64: 8, 64>}, {pipeline_mode = #tpu.pipeline_mode<synchronous>, transform_indices = @transform_5, window_bounds = array<i64: 8, 64>}, {pipeline_mode = #tpu.pipeline_mode<synchronous>, transform_indices = @transform_6, window_bounds = array<i64: 8, 256>}, {pipeline_mode = #tpu.pipeline_mode<synchronous>, transform_indices = @transform_7, window_bounds = array<i64: 8, 64>}, {pipeline_mode = #tpu.pipeline_mode<synchronous>, transform_indices = @transform_8, window_bounds = array<i64: 8, 64>}]} {
    %c0 = arith.constant 0 : index
    %c0_0 = arith.constant 0 : index
    %0 = vector.load %arg1[%c0, %c0_0] : memref<72x16xf32, #tpu.memory_space<vmem>>, vector<72x16xf32>
    %c0_1 = arith.constant 0 : index
    %c0_2 = arith.constant 0 : index
    %1 = vector.load %arg2[%c0_1, %c0_2] : memref<16x256xf32, #tpu.memory_space<vmem>>, vector<16x256xf32>
    %cst = arith.constant dense<0.000000e+00> : vector<72x256xf32>
    %2 = tpu.matmul %0, %1, %cst {dimension_numbers = #tpu.dot_dimension_numbers<[1], [0], [0], [1], [0, 0, 1, 1], [], []>} : vector<72x16xf32>, vector<16x256xf32>, vector<72x256xf32> -> vector<72x256xf32>
    %c0_3 = arith.constant 0 : index
    %c0_4 = arith.constant 0 : index
    %3 = vector.load %arg4[%c0_3, %c0_4] : memref<1x256xf32, #tpu.memory_space<vmem>>, vector<1x256xf32>
    %4 = vector.broadcast %3 : vector<1x256xf32> to vector<72x256xf32>
    %5 = arith.addf %2, %4 : vector<72x256xf32>
    %c0_5 = arith.constant 0 : index
    %c0_6 = arith.constant 0 : index
    %6 = vector.load %arg3[%c0_5, %c0_6] : memref<64x256xf32, #tpu.memory_space<vmem>>, vector<64x256xf32>
    %c0_7 = arith.constant 0 : index
    %c0_8 = arith.constant 0 : index
    %7 = vector.load %arg5[%c0_7, %c0_8] : memref<8x64xf32, #tpu.memory_space<vmem>>, vector<8x64xf32>
    %c0_9 = arith.constant 0 : index
    %c0_10 = arith.constant 0 : index
    %8 = vector.load %arg6[%c0_9, %c0_10] : memref<8x64xf32, #tpu.memory_space<vmem>>, vector<8x64xf32>
    %9 = tpu.iota {dimensions = array<i32: 1>} : vector<8x64xi32>
    %c32_i32 = arith.constant 32 : i32
    %10 = vector.broadcast %c32_i32 : i32 to vector<8x64xi32>
    %11 = arith.cmpi slt, %9, %10 : vector<8x64xi32>
    %12 = vector.extract_strided_slice %5 {offsets = [0, 0], sizes = [8, 256], strides = [1, 1]} : vector<72x256xf32> to vector<8x256xf32>
    %cst_11 = arith.constant dense<0.000000e+00> : vector<8x256xf32>
    %13 = tpu.matmul %7, %6, %cst_11 {dimension_numbers = #tpu.dot_dimension_numbers<[1], [0], [0], [1], [0, 0, 1, 1], [], []>} : vector<8x64xf32>, vector<64x256xf32>, vector<8x256xf32> -> vector<8x256xf32>
    %14 = arith.addf %12, %13 : vector<8x256xf32>
    %15 = arith.negf %14 : vector<8x256xf32>
    %16 = math.exp %15 : vector<8x256xf32>
    %cst_12 = arith.constant 1.000000e+00 : f32
    %17 = vector.broadcast %cst_12 : f32 to vector<8x256xf32>
    %18 = arith.addf %17, %16 : vector<8x256xf32>
    %19 = arith.divf %17, %18 : vector<8x256xf32>
    %20 = vector.extract_strided_slice %19 {offsets = [0, 0], sizes = [8, 64], strides = [1, 1]} : vector<8x256xf32> to vector<8x64xf32>
    %21 = vector.extract_strided_slice %19 {offsets = [0, 64], sizes = [8, 64], strides = [1, 1]} : vector<8x256xf32> to vector<8x64xf32>
    %22 = vector.extract_strided_slice %19 {offsets = [0, 128], sizes = [8, 64], strides = [1, 1]} : vector<8x256xf32> to vector<8x64xf32>
    %cst_13 = arith.constant 2.000000e+00 : f32
    %23 = vector.broadcast %cst_13 : f32 to vector<8x64xf32>
    %24 = arith.mulf %23, %22 : vector<8x64xf32>
    %cst_14 = arith.constant 1.000000e+00 : f32
    %25 = vector.broadcast %cst_14 : f32 to vector<8x64xf32>
    %26 = arith.subf %24, %25 : vector<8x64xf32>
    %27 = vector.extract_strided_slice %19 {offsets = [0, 192], sizes = [8, 64], strides = [1, 1]} : vector<8x256xf32> to vector<8x64xf32>
    %28 = arith.mulf %21, %8 : vector<8x64xf32>
    %29 = arith.mulf %20, %26 : vector<8x64xf32>
    %30 = arith.addf %28, %29 : vector<8x64xf32>
    %31 = math.tanh %30 : vector<8x64xf32>
    %32 = arith.mulf %27, %31 : vector<8x64xf32>
    %33 = arith.select %11, %30, %8 : vector<8x64xi1>, vector<8x64xf32>
    %34 = arith.select %11, %32, %7 : vector<8x64xi1>, vector<8x64xf32>
    %35 = vector.extract_strided_slice %5 {offsets = [8, 0], sizes = [8, 256], strides = [1, 1]} : vector<72x256xf32> to vector<8x256xf32>
    %cst_15 = arith.constant dense<0.000000e+00> : vector<8x256xf32>
    %36 = tpu.matmul %34, %6, %cst_15 {dimension_numbers = #tpu.dot_dimension_numbers<[1], [0], [0], [1], [0, 0, 1, 1], [], []>} : vector<8x64xf32>, vector<64x256xf32>, vector<8x256xf32> -> vector<8x256xf32>
    %37 = arith.addf %35, %36 : vector<8x256xf32>
    %38 = arith.negf %37 : vector<8x256xf32>
    %39 = math.exp %38 : vector<8x256xf32>
    %cst_16 = arith.constant 1.000000e+00 : f32
    %40 = vector.broadcast %cst_16 : f32 to vector<8x256xf32>
    %41 = arith.addf %40, %39 : vector<8x256xf32>
    %42 = arith.divf %40, %41 : vector<8x256xf32>
    %43 = vector.extract_strided_slice %42 {offsets = [0, 0], sizes = [8, 64], strides = [1, 1]} : vector<8x256xf32> to vector<8x64xf32>
    %44 = vector.extract_strided_slice %42 {offsets = [0, 64], sizes = [8, 64], strides = [1, 1]} : vector<8x256xf32> to vector<8x64xf32>
    %45 = vector.extract_strided_slice %42 {offsets = [0, 128], sizes = [8, 64], strides = [1, 1]} : vector<8x256xf32> to vector<8x64xf32>
    %cst_17 = arith.constant 2.000000e+00 : f32
    %46 = vector.broadcast %cst_17 : f32 to vector<8x64xf32>
    %47 = arith.mulf %46, %45 : vector<8x64xf32>
    %cst_18 = arith.constant 1.000000e+00 : f32
    %48 = vector.broadcast %cst_18 : f32 to vector<8x64xf32>
    %49 = arith.subf %47, %48 : vector<8x64xf32>
    %50 = vector.extract_strided_slice %42 {offsets = [0, 192], sizes = [8, 64], strides = [1, 1]} : vector<8x256xf32> to vector<8x64xf32>
    %51 = arith.mulf %44, %33 : vector<8x64xf32>
    %52 = arith.mulf %43, %49 : vector<8x64xf32>
    %53 = arith.addf %51, %52 : vector<8x64xf32>
    %54 = math.tanh %53 : vector<8x64xf32>
    %55 = arith.mulf %50, %54 : vector<8x64xf32>
    %56 = vector.extract_strided_slice %55 {offsets = [0, 32], sizes = [8, 32], strides = [1, 1]} : vector<8x64xf32> to vector<8x32xf32>
    %57 = vector.extract_strided_slice %5 {offsets = [16, 0], sizes = [8, 256], strides = [1, 1]} : vector<72x256xf32> to vector<8x256xf32>
    %cst_19 = arith.constant dense<0.000000e+00> : vector<8x256xf32>
    %58 = tpu.matmul %55, %6, %cst_19 {dimension_numbers = #tpu.dot_dimension_numbers<[1], [0], [0], [1], [0, 0, 1, 1], [], []>} : vector<8x64xf32>, vector<64x256xf32>, vector<8x256xf32> -> vector<8x256xf32>
    %59 = arith.addf %57, %58 : vector<8x256xf32>
    %60 = arith.negf %59 : vector<8x256xf32>
    %61 = math.exp %60 : vector<8x256xf32>
    %cst_20 = arith.constant 1.000000e+00 : f32
    %62 = vector.broadcast %cst_20 : f32 to vector<8x256xf32>
    %63 = arith.addf %62, %61 : vector<8x256xf32>
    %64 = arith.divf %62, %63 : vector<8x256xf32>
    %65 = vector.extract_strided_slice %64 {offsets = [0, 0], sizes = [8, 64], strides = [1, 1]} : vector<8x256xf32> to vector<8x64xf32>
    %66 = vector.extract_strided_slice %64 {offsets = [0, 64], sizes = [8, 64], strides = [1, 1]} : vector<8x256xf32> to vector<8x64xf32>
    %67 = vector.extract_strided_slice %64 {offsets = [0, 128], sizes = [8, 64], strides = [1, 1]} : vector<8x256xf32> to vector<8x64xf32>
    %cst_21 = arith.constant 2.000000e+00 : f32
    %68 = vector.broadcast %cst_21 : f32 to vector<8x64xf32>
    %69 = arith.mulf %68, %67 : vector<8x64xf32>
    %cst_22 = arith.constant 1.000000e+00 : f32
    %70 = vector.broadcast %cst_22 : f32 to vector<8x64xf32>
    %71 = arith.subf %69, %70 : vector<8x64xf32>
    %72 = vector.extract_strided_slice %64 {offsets = [0, 192], sizes = [8, 64], strides = [1, 1]} : vector<8x256xf32> to vector<8x64xf32>
    %73 = arith.mulf %66, %53 : vector<8x64xf32>
    %74 = arith.mulf %65, %71 : vector<8x64xf32>
    %75 = arith.addf %73, %74 : vector<8x64xf32>
    %76 = math.tanh %75 : vector<8x64xf32>
    %77 = arith.mulf %72, %76 : vector<8x64xf32>
    %78 = vector.extract_strided_slice %77 {offsets = [0, 32], sizes = [8, 32], strides = [1, 1]} : vector<8x64xf32> to vector<8x32xf32>
    %79 = vector.extract_strided_slice %5 {offsets = [24, 0], sizes = [8, 256], strides = [1, 1]} : vector<72x256xf32> to vector<8x256xf32>
    %cst_23 = arith.constant dense<0.000000e+00> : vector<8x256xf32>
    %80 = tpu.matmul %77, %6, %cst_23 {dimension_numbers = #tpu.dot_dimension_numbers<[1], [0], [0], [1], [0, 0, 1, 1], [], []>} : vector<8x64xf32>, vector<64x256xf32>, vector<8x256xf32> -> vector<8x256xf32>
    %81 = arith.addf %79, %80 : vector<8x256xf32>
    %82 = arith.negf %81 : vector<8x256xf32>
    %83 = math.exp %82 : vector<8x256xf32>
    %cst_24 = arith.constant 1.000000e+00 : f32
    %84 = vector.broadcast %cst_24 : f32 to vector<8x256xf32>
    %85 = arith.addf %84, %83 : vector<8x256xf32>
    %86 = arith.divf %84, %85 : vector<8x256xf32>
    %87 = vector.extract_strided_slice %86 {offsets = [0, 0], sizes = [8, 64], strides = [1, 1]} : vector<8x256xf32> to vector<8x64xf32>
    %88 = vector.extract_strided_slice %86 {offsets = [0, 64], sizes = [8, 64], strides = [1, 1]} : vector<8x256xf32> to vector<8x64xf32>
    %89 = vector.extract_strided_slice %86 {offsets = [0, 128], sizes = [8, 64], strides = [1, 1]} : vector<8x256xf32> to vector<8x64xf32>
    %cst_25 = arith.constant 2.000000e+00 : f32
    %90 = vector.broadcast %cst_25 : f32 to vector<8x64xf32>
    %91 = arith.mulf %90, %89 : vector<8x64xf32>
    %cst_26 = arith.constant 1.000000e+00 : f32
    %92 = vector.broadcast %cst_26 : f32 to vector<8x64xf32>
    %93 = arith.subf %91, %92 : vector<8x64xf32>
    %94 = vector.extract_strided_slice %86 {offsets = [0, 192], sizes = [8, 64], strides = [1, 1]} : vector<8x256xf32> to vector<8x64xf32>
    %95 = arith.mulf %88, %75 : vector<8x64xf32>
    %96 = arith.mulf %87, %93 : vector<8x64xf32>
    %97 = arith.addf %95, %96 : vector<8x64xf32>
    %98 = math.tanh %97 : vector<8x64xf32>
    %99 = arith.mulf %94, %98 : vector<8x64xf32>
    %100 = vector.extract_strided_slice %99 {offsets = [0, 32], sizes = [8, 32], strides = [1, 1]} : vector<8x64xf32> to vector<8x32xf32>
    %101 = vector.extract_strided_slice %5 {offsets = [32, 0], sizes = [8, 256], strides = [1, 1]} : vector<72x256xf32> to vector<8x256xf32>
    %cst_27 = arith.constant dense<0.000000e+00> : vector<8x256xf32>
    %102 = tpu.matmul %99, %6, %cst_27 {dimension_numbers = #tpu.dot_dimension_numbers<[1], [0], [0], [1], [0, 0, 1, 1], [], []>} : vector<8x64xf32>, vector<64x256xf32>, vector<8x256xf32> -> vector<8x256xf32>
    %103 = arith.addf %101, %102 : vector<8x256xf32>
    %104 = arith.negf %103 : vector<8x256xf32>
    %105 = math.exp %104 : vector<8x256xf32>
    %cst_28 = arith.constant 1.000000e+00 : f32
    %106 = vector.broadcast %cst_28 : f32 to vector<8x256xf32>
    %107 = arith.addf %106, %105 : vector<8x256xf32>
    %108 = arith.divf %106, %107 : vector<8x256xf32>
    %109 = vector.extract_strided_slice %108 {offsets = [0, 0], sizes = [8, 64], strides = [1, 1]} : vector<8x256xf32> to vector<8x64xf32>
    %110 = vector.extract_strided_slice %108 {offsets = [0, 64], sizes = [8, 64], strides = [1, 1]} : vector<8x256xf32> to vector<8x64xf32>
    %111 = vector.extract_strided_slice %108 {offsets = [0, 128], sizes = [8, 64], strides = [1, 1]} : vector<8x256xf32> to vector<8x64xf32>
    %cst_29 = arith.constant 2.000000e+00 : f32
    %112 = vector.broadcast %cst_29 : f32 to vector<8x64xf32>
    %113 = arith.mulf %112, %111 : vector<8x64xf32>
    %cst_30 = arith.constant 1.000000e+00 : f32
    %114 = vector.broadcast %cst_30 : f32 to vector<8x64xf32>
    %115 = arith.subf %113, %114 : vector<8x64xf32>
    %116 = vector.extract_strided_slice %108 {offsets = [0, 192], sizes = [8, 64], strides = [1, 1]} : vector<8x256xf32> to vector<8x64xf32>
    %117 = arith.mulf %110, %97 : vector<8x64xf32>
    %118 = arith.mulf %109, %115 : vector<8x64xf32>
    %119 = arith.addf %117, %118 : vector<8x64xf32>
    %120 = math.tanh %119 : vector<8x64xf32>
    %121 = arith.mulf %116, %120 : vector<8x64xf32>
    %122 = vector.extract_strided_slice %121 {offsets = [0, 32], sizes = [8, 32], strides = [1, 1]} : vector<8x64xf32> to vector<8x32xf32>
    %123 = vector.extract_strided_slice %5 {offsets = [40, 0], sizes = [8, 256], strides = [1, 1]} : vector<72x256xf32> to vector<8x256xf32>
    %cst_31 = arith.constant dense<0.000000e+00> : vector<8x256xf32>
    %124 = tpu.matmul %121, %6, %cst_31 {dimension_numbers = #tpu.dot_dimension_numbers<[1], [0], [0], [1], [0, 0, 1, 1], [], []>} : vector<8x64xf32>, vector<64x256xf32>, vector<8x256xf32> -> vector<8x256xf32>
    %125 = arith.addf %123, %124 : vector<8x256xf32>
    %126 = arith.negf %125 : vector<8x256xf32>
    %127 = math.exp %126 : vector<8x256xf32>
    %cst_32 = arith.constant 1.000000e+00 : f32
    %128 = vector.broadcast %cst_32 : f32 to vector<8x256xf32>
    %129 = arith.addf %128, %127 : vector<8x256xf32>
    %130 = arith.divf %128, %129 : vector<8x256xf32>
    %131 = vector.extract_strided_slice %130 {offsets = [0, 0], sizes = [8, 64], strides = [1, 1]} : vector<8x256xf32> to vector<8x64xf32>
    %132 = vector.extract_strided_slice %130 {offsets = [0, 64], sizes = [8, 64], strides = [1, 1]} : vector<8x256xf32> to vector<8x64xf32>
    %133 = vector.extract_strided_slice %130 {offsets = [0, 128], sizes = [8, 64], strides = [1, 1]} : vector<8x256xf32> to vector<8x64xf32>
    %cst_33 = arith.constant 2.000000e+00 : f32
    %134 = vector.broadcast %cst_33 : f32 to vector<8x64xf32>
    %135 = arith.mulf %134, %133 : vector<8x64xf32>
    %cst_34 = arith.constant 1.000000e+00 : f32
    %136 = vector.broadcast %cst_34 : f32 to vector<8x64xf32>
    %137 = arith.subf %135, %136 : vector<8x64xf32>
    %138 = vector.extract_strided_slice %130 {offsets = [0, 192], sizes = [8, 64], strides = [1, 1]} : vector<8x256xf32> to vector<8x64xf32>
    %139 = arith.mulf %132, %119 : vector<8x64xf32>
    %140 = arith.mulf %131, %137 : vector<8x64xf32>
    %141 = arith.addf %139, %140 : vector<8x64xf32>
    %142 = math.tanh %141 : vector<8x64xf32>
    %143 = arith.mulf %138, %142 : vector<8x64xf32>
    %144 = vector.extract_strided_slice %143 {offsets = [0, 32], sizes = [8, 32], strides = [1, 1]} : vector<8x64xf32> to vector<8x32xf32>
    %145 = vector.extract_strided_slice %5 {offsets = [48, 0], sizes = [8, 256], strides = [1, 1]} : vector<72x256xf32> to vector<8x256xf32>
    %cst_35 = arith.constant dense<0.000000e+00> : vector<8x256xf32>
    %146 = tpu.matmul %143, %6, %cst_35 {dimension_numbers = #tpu.dot_dimension_numbers<[1], [0], [0], [1], [0, 0, 1, 1], [], []>} : vector<8x64xf32>, vector<64x256xf32>, vector<8x256xf32> -> vector<8x256xf32>
    %147 = arith.addf %145, %146 : vector<8x256xf32>
    %148 = arith.negf %147 : vector<8x256xf32>
    %149 = math.exp %148 : vector<8x256xf32>
    %cst_36 = arith.constant 1.000000e+00 : f32
    %150 = vector.broadcast %cst_36 : f32 to vector<8x256xf32>
    %151 = arith.addf %150, %149 : vector<8x256xf32>
    %152 = arith.divf %150, %151 : vector<8x256xf32>
    %153 = vector.extract_strided_slice %152 {offsets = [0, 0], sizes = [8, 64], strides = [1, 1]} : vector<8x256xf32> to vector<8x64xf32>
    %154 = vector.extract_strided_slice %152 {offsets = [0, 64], sizes = [8, 64], strides = [1, 1]} : vector<8x256xf32> to vector<8x64xf32>
    %155 = vector.extract_strided_slice %152 {offsets = [0, 128], sizes = [8, 64], strides = [1, 1]} : vector<8x256xf32> to vector<8x64xf32>
    %cst_37 = arith.constant 2.000000e+00 : f32
    %156 = vector.broadcast %cst_37 : f32 to vector<8x64xf32>
    %157 = arith.mulf %156, %155 : vector<8x64xf32>
    %cst_38 = arith.constant 1.000000e+00 : f32
    %158 = vector.broadcast %cst_38 : f32 to vector<8x64xf32>
    %159 = arith.subf %157, %158 : vector<8x64xf32>
    %160 = vector.extract_strided_slice %152 {offsets = [0, 192], sizes = [8, 64], strides = [1, 1]} : vector<8x256xf32> to vector<8x64xf32>
    %161 = arith.mulf %154, %141 : vector<8x64xf32>
    %162 = arith.mulf %153, %159 : vector<8x64xf32>
    %163 = arith.addf %161, %162 : vector<8x64xf32>
    %164 = math.tanh %163 : vector<8x64xf32>
    %165 = arith.mulf %160, %164 : vector<8x64xf32>
    %166 = vector.extract_strided_slice %165 {offsets = [0, 32], sizes = [8, 32], strides = [1, 1]} : vector<8x64xf32> to vector<8x32xf32>
    %167 = vector.extract_strided_slice %5 {offsets = [56, 0], sizes = [8, 256], strides = [1, 1]} : vector<72x256xf32> to vector<8x256xf32>
    %cst_39 = arith.constant dense<0.000000e+00> : vector<8x256xf32>
    %168 = tpu.matmul %165, %6, %cst_39 {dimension_numbers = #tpu.dot_dimension_numbers<[1], [0], [0], [1], [0, 0, 1, 1], [], []>} : vector<8x64xf32>, vector<64x256xf32>, vector<8x256xf32> -> vector<8x256xf32>
    %169 = arith.addf %167, %168 : vector<8x256xf32>
    %170 = arith.negf %169 : vector<8x256xf32>
    %171 = math.exp %170 : vector<8x256xf32>
    %cst_40 = arith.constant 1.000000e+00 : f32
    %172 = vector.broadcast %cst_40 : f32 to vector<8x256xf32>
    %173 = arith.addf %172, %171 : vector<8x256xf32>
    %174 = arith.divf %172, %173 : vector<8x256xf32>
    %175 = vector.extract_strided_slice %174 {offsets = [0, 0], sizes = [8, 64], strides = [1, 1]} : vector<8x256xf32> to vector<8x64xf32>
    %176 = vector.extract_strided_slice %174 {offsets = [0, 64], sizes = [8, 64], strides = [1, 1]} : vector<8x256xf32> to vector<8x64xf32>
    %177 = vector.extract_strided_slice %174 {offsets = [0, 128], sizes = [8, 64], strides = [1, 1]} : vector<8x256xf32> to vector<8x64xf32>
    %cst_41 = arith.constant 2.000000e+00 : f32
    %178 = vector.broadcast %cst_41 : f32 to vector<8x64xf32>
    %179 = arith.mulf %178, %177 : vector<8x64xf32>
    %cst_42 = arith.constant 1.000000e+00 : f32
    %180 = vector.broadcast %cst_42 : f32 to vector<8x64xf32>
    %181 = arith.subf %179, %180 : vector<8x64xf32>
    %182 = vector.extract_strided_slice %174 {offsets = [0, 192], sizes = [8, 64], strides = [1, 1]} : vector<8x256xf32> to vector<8x64xf32>
    %183 = arith.mulf %176, %163 : vector<8x64xf32>
    %184 = arith.mulf %175, %181 : vector<8x64xf32>
    %185 = arith.addf %183, %184 : vector<8x64xf32>
    %186 = math.tanh %185 : vector<8x64xf32>
    %187 = arith.mulf %182, %186 : vector<8x64xf32>
    %188 = vector.extract_strided_slice %187 {offsets = [0, 32], sizes = [8, 32], strides = [1, 1]} : vector<8x64xf32> to vector<8x32xf32>
    %189 = vector.extract_strided_slice %5 {offsets = [64, 0], sizes = [8, 256], strides = [1, 1]} : vector<72x256xf32> to vector<8x256xf32>
    %cst_43 = arith.constant dense<0.000000e+00> : vector<8x256xf32>
    %190 = tpu.matmul %187, %6, %cst_43 {dimension_numbers = #tpu.dot_dimension_numbers<[1], [0], [0], [1], [0, 0, 1, 1], [], []>} : vector<8x64xf32>, vector<64x256xf32>, vector<8x256xf32> -> vector<8x256xf32>
    %191 = arith.addf %189, %190 : vector<8x256xf32>
    %192 = arith.negf %191 : vector<8x256xf32>
    %193 = math.exp %192 : vector<8x256xf32>
    %cst_44 = arith.constant 1.000000e+00 : f32
    %194 = vector.broadcast %cst_44 : f32 to vector<8x256xf32>
    %195 = arith.addf %194, %193 : vector<8x256xf32>
    %196 = arith.divf %194, %195 : vector<8x256xf32>
    %197 = vector.extract_strided_slice %196 {offsets = [0, 0], sizes = [8, 64], strides = [1, 1]} : vector<8x256xf32> to vector<8x64xf32>
    %198 = vector.extract_strided_slice %196 {offsets = [0, 64], sizes = [8, 64], strides = [1, 1]} : vector<8x256xf32> to vector<8x64xf32>
    %199 = vector.extract_strided_slice %196 {offsets = [0, 128], sizes = [8, 64], strides = [1, 1]} : vector<8x256xf32> to vector<8x64xf32>
    %cst_45 = arith.constant 2.000000e+00 : f32
    %200 = vector.broadcast %cst_45 : f32 to vector<8x64xf32>
    %201 = arith.mulf %200, %199 : vector<8x64xf32>
    %cst_46 = arith.constant 1.000000e+00 : f32
    %202 = vector.broadcast %cst_46 : f32 to vector<8x64xf32>
    %203 = arith.subf %201, %202 : vector<8x64xf32>
    %204 = vector.extract_strided_slice %196 {offsets = [0, 192], sizes = [8, 64], strides = [1, 1]} : vector<8x256xf32> to vector<8x64xf32>
    %205 = arith.mulf %198, %185 : vector<8x64xf32>
    %206 = arith.mulf %197, %203 : vector<8x64xf32>
    %207 = arith.addf %205, %206 : vector<8x64xf32>
    %208 = math.tanh %207 : vector<8x64xf32>
    %209 = arith.mulf %204, %208 : vector<8x64xf32>
    %210 = arith.select %11, %185, %207 : vector<8x64xi1>, vector<8x64xf32>
    %211 = arith.select %11, %187, %209 : vector<8x64xi1>, vector<8x64xf32>
    %212 = vector.extract_strided_slice %209 {offsets = [0, 32], sizes = [8, 32], strides = [1, 1]} : vector<8x64xf32> to vector<8x32xf32>
    %213 = tpu.concatenate %56, %78, %100, %122, %144, %166, %188, %212 in 1 : vector<8x32xf32>, vector<8x32xf32>, vector<8x32xf32>, vector<8x32xf32>, vector<8x32xf32>, vector<8x32xf32>, vector<8x32xf32>, vector<8x32xf32> -> vector<8x256xf32>
    %c0_47 = arith.constant 0 : index
    %c0_48 = arith.constant 0 : index
    %214 = vector.load %arg7[%c0_47, %c0_48] : memref<8x256xf32, #tpu.memory_space<vmem>>, vector<8x256xf32>
    tpu.vector_store %arg7[%c0_47, %c0_48], %213 {strides = array<i32>} : memref<8x256xf32, #tpu.memory_space<vmem>>, vector<8x256xf32>,
    %c0_49 = arith.constant 0 : index
    %c0_50 = arith.constant 0 : index
    %215 = vector.load %arg8[%c0_49, %c0_50] : memref<8x64xf32, #tpu.memory_space<vmem>>, vector<8x64xf32>
    tpu.vector_store %arg8[%c0_49, %c0_50], %211 {strides = array<i32>} : memref<8x64xf32, #tpu.memory_space<vmem>>, vector<8x64xf32>,
    %c0_51 = arith.constant 0 : index
    %c0_52 = arith.constant 0 : index
    %216 = vector.load %arg9[%c0_51, %c0_52] : memref<8x64xf32, #tpu.memory_space<vmem>>, vector<8x64xf32>
    tpu.vector_store %arg9[%c0_51, %c0_52], %210 {strides = array<i32>} : memref<8x64xf32, #tpu.memory_space<vmem>>, vector<8x64xf32>,
    return
  }
  func.func @transform_0(%arg0: i32) -> (i32, i32) {
    %c0_i32 = arith.constant 0 : i32
    %c0_i32_0 = arith.constant 0 : i32
    %c0_i32_1 = arith.constant 0 : i32
    return %c0_i32, %c0_i32_0 : i32, i32
  }
  func.func @transform_1(%arg0: i32) -> (i32, i32) {
    %c0_i32 = arith.constant 0 : i32
    %c0_i32_0 = arith.constant 0 : i32
    %c0_i32_1 = arith.constant 0 : i32
    return %c0_i32, %c0_i32_0 : i32, i32
  }
  func.func @transform_2(%arg0: i32) -> (i32, i32) {
    %c0_i32 = arith.constant 0 : i32
    %c0_i32_0 = arith.constant 0 : i32
    %c0_i32_1 = arith.constant 0 : i32
    return %c0_i32, %c0_i32_0 : i32, i32
  }
  func.func @transform_3(%arg0: i32) -> (i32, i32) {
    %c0_i32 = arith.constant 0 : i32
    %c0_i32_0 = arith.constant 0 : i32
    %c0_i32_1 = arith.constant 0 : i32
    return %c0_i32, %c0_i32_0 : i32, i32
  }
  func.func @transform_4(%arg0: i32) -> (i32, i32) {
    %c0_i32 = arith.constant 0 : i32
    %c0_i32_0 = arith.constant 0 : i32
    %c0_i32_1 = arith.constant 0 : i32
    return %c0_i32, %c0_i32_0 : i32, i32
  }
  func.func @transform_5(%arg0: i32) -> (i32, i32) {
    %c0_i32 = arith.constant 0 : i32
    %c0_i32_0 = arith.constant 0 : i32
    %c0_i32_1 = arith.constant 0 : i32
    return %c0_i32, %c0_i32_0 : i32, i32
  }
  func.func @transform_6(%arg0: i32) -> (i32, i32) {
    %c0_i32 = arith.constant 0 : i32
    %c0_i32_0 = arith.constant 0 : i32
    %c0_i32_1 = arith.constant 0 : i32
    return %c0_i32, %c0_i32_0 : i32, i32
  }
  func.func @transform_7(%arg0: i32) -> (i32, i32) {
    %c0_i32 = arith.constant 0 : i32
    %c0_i32_0 = arith.constant 0 : i32
    %c0_i32_1 = arith.constant 0 : i32
    return %c0_i32, %c0_i32_0 : i32, i32
  }
  func.func @transform_8(%arg0: i32) -> (i32, i32) {
    %c0_i32 = arith.constant 0 : i32
    %c0_i32_0 = arith.constant 0 : i32
    %c0_i32_1 = arith.constant 0 : i32
    return %c0_i32, %c0_i32_0 : i32, i32
  }
}

</mosaic_0001>

<bundles_post_ra>
// kernel: mul.17
= control target key start
LH: loop header
LB: loop body
LE: loop exit
PB: predicated region body
PF: predicated region fallthrough
CT: control target
= control target key end

     0   :  { %s56_s0 = inlined_call_operand.vmem [shape: f32[1,256], index: 0, kind: input, shape index: {}]   ;;  %s57_s1 = inlined_call_operand.vmem [shape: f32[1,256], index: 1, kind: input, shape index: {}]   ;;  %s58_s2 = inlined_call_operand.vmem [shape: f32[1,256], index: 2, kind: output, shape index: {}]  }
   0x1   :  { %v3_v0 = vld [vmem:[%s56_s0] sm:$0x1]  ;;  %v20_v2 = vld [vmem:[%s56_s0 + $0x1] sm:$0x1] }
   0x2   :  { %v4_v1 = vld [vmem:[%s57_s1] sm:$0x1]  ;;  %v21_v4 = vld [vmem:[%s57_s1 + $0x1] sm:$0x1] }
   0x3   :  { %v7_v3 = vmul.f32 %v4_v1, %v3_v0  ;;  %v16_v5 = vmul.f32 %v21_v4, %v20_v2 }
   0x5   :  { %9 = vst [vmem:[%s58_s2] sm:$0x1] %v7_v3 }
   0x6   :  { %22 = vst [vmem:[%s58_s2 + $0x1] sm:$0x1] %v16_v5 }

// kernel: striped_lstm_forward.1
= control target key start
LH: loop header
LB: loop body
LE: loop exit
PB: predicated region body
PF: predicated region fallthrough
CT: control target
= control target key end

     0   :  { %vm45_vm0 = vcmask 130048   ;;  %s1270_s25 = smov 64   ;;  %vm182_vm1 = vcmask 523264   ;;  %s1272_s20 = smov 96   ;;  %s1776_s2 = inlined_call_operand.vmem [shape: f32[64,256], index: 2, kind: input, shape index: {}]   ;;  %s1777_s1 = inlined_call_operand.vmem [shape: f32[16,256], index: 1, kind: input, shape index: {}]   ;;  %s1778_s0 = inlined_call_operand.vmem [shape: f32[72,16], index: 0, kind: input, shape index: {}]   ;;  %s1779_s5 = inlined_call_operand.vmem [shape: f32[8,64], index: 5, kind: input, shape index: {}, may-alias: {4,5}]   ;;  %s1780_s4 = inlined_call_operand.vmem [shape: f32[8,64], index: 4, kind: input, shape index: {}, may-alias: {4,5}]   ;;  %s1781_s3 = inlined_call_operand.vmem [shape: f32[1,256], index: 3, kind: input, shape index: {}]   ;;  %s1782_s6 = inlined_call_operand.vmem [shape: f32[8,256], index: 6, kind: output, shape index: {0}]   ;;  %s1783_s7 = inlined_call_operand.vmem [shape: f32[8,64], index: 7, kind: output, shape index: {1}]   ;;  %s1784_s8 = inlined_call_operand.vmem [shape: f32[8,64], index: 8, kind: output, shape index: {2}]  }
   0x1   :  { %v1321_v0 = vld [vmem:[%s1776_s2 + $0x70] sm:$0xff]  ;;  %v1326_v1 = vld [vmem:[%s1776_s2 + $0x78] sm:$0xff]  ;;  %v1331_v2 = vld [vmem:[%s1776_s2 + $0x60] sm:$0xff] }
   0x2   :  { %194 = vmatpush.msra.mxu2 %v1321_v0  ;;  %214 = vmatpush.msra.mxu3 %v1326_v1  ;;  %v1338_v3 = vld [vmem:[%s1776_s2 + $0x68] sm:$0xff]  ;;  %v1343_v4 = vld [vmem:[%s1776_s2 + $0x50] sm:$0xff]  ;;  %v1348_v5 = vld [vmem:[%s1776_s2 + $0x58] sm:$0xff] }
   0x3   :  { %v1355_v6 = vld [vmem:[%s1776_s2 + $0x40] sm:$0xff]  ;;  %v1360_v7 = vld [vmem:[%s1776_s2 + $0x48] sm:$0xff]  ;;  %v1367_v8 = vld [vmem:[%s1776_s2 + $0x30] sm:$0xff] }
   0x4   :  { %195 = vmatpush.msra.mxu2 %v1331_v2  ;;  %215 = vmatpush.msra.mxu3 %v1338_v3  ;;  %v37_v9 = vld [vmem:[%s1777_s1 + $0x10] sm:$0xff]  ;;  %v1375_v10 = vld [vmem:[%s1776_s2 + $0x38] sm:$0xff]  ;;  %v35_v12 = vld [vmem:[%s1777_s1] sm:$0xff] }
   0x5   :  { %87 = vmatpush.msra.mxu0 %v37_v9  ;;  %v38_v11 = vld [vmem:[%s1777_s1 + $0x18] sm:$0xff]  ;;  %v36_v13 = vld [vmem:[%s1777_s1 + $0x8] sm:$0xff]  ;;  %v26_v14 = vld [vmem:[%s1778_s0] sm:$0xff] }
   0x6   :  { %196 = vmatpush.msra.mxu2 %v1343_v4  ;;  %216 = vmatpush.msra.mxu3 %v1348_v5  ;;  %v1394_v15 = vld [vmem:[%s1776_s2 + $0x20] sm:$0xff]  ;;  %v1399_v16 = vld [vmem:[%s1776_s2 + $0x28] sm:$0xff]  ;;  %v1411_v18 = vld [vmem:[%s1776_s2 + $0x10] sm:$0xff] }
   0x7   :  { %131 = vmatpush.msra.mxu1 %v38_v11  ;;  %88 = vmatpush.msra.mxu0 %v35_v12  ;;  %v1406_v17 = vld [vmem:[%s1779_s5] sm:$0xff]  ;;  %v1416_v19 = vld [vmem:[%s1776_s2 + $0x18] sm:$0xff]  ;;  %v1429_v21 = vld [vmem:[%s1776_s2 + $0x8] sm:$0xff] }
   0x8   :  { %197 = vmatpush.msra.mxu2 %v1355_v6  ;;  %217 = vmatpush.msra.mxu3 %v1360_v7  ;;  %v1424_v20 = vld [vmem:[%s1776_s2] sm:$0xff] }
   0x9   :  { %132 = vmatpush.msra.mxu1 %v36_v13  ;;  %1114 = vmatmul.msk.f32.vlgmr.msra.gmra.mxu0 %vm45_vm0, %v26_v14  ;;  %v1439_v22 = vld [vmem:[%s1780_s4] sm:$0xff] }
   0xa   :  { %198 = vmatpush.msra.mxu2 %v1367_v8  ;;  %218 = vmatpush.msra.mxu3 %v1375_v10  ;;  %v39_v23 = vld [vmem:[%s1781_s3] sm:$0x3] }
   0xb   :  { %1123 = vmatmul.msk.f32.vlgmr.msra.gmra.mxu1 %vm45_vm0, %v26_v14  ;;  %269 = vrot.lane.b32.xlu0 %v1406_v17, %s1270_s25  ;;  %v1514_v24 = vperm.slane %v39_v23, 0  ;;  %v1516_v25 = vperm.slane %v39_v23, 1  ;;  %v27_v23 = vld [vmem:[%s1778_s0 + $0x8] sm:$0xff] }
   0xc   :  { %199 = vmatpush.msra.mxu2 %v1394_v15  ;;  %219 = vmatpush.msra.mxu3 %v1399_v16 }
   0xd   :  { %614 = vmatpush.msrb.mxu1 %v1326_v1  ;;  %594 = vmatpush.msrb.mxu0 %v1321_v0 }
   0xe   :  { %200 = vmatpush.msra.mxu2 %v1411_v18  ;;  %220 = vmatpush.msra.mxu3 %v1416_v19 }
   0xf   :  { %615 = vmatpush.msrb.mxu1 %v1338_v3  ;;  %595 = vmatpush.msrb.mxu0 %v1331_v2 }
  0x10   :  { %201 = vmatpush.msra.mxu2 %v1424_v20  ;;  %221 = vmatpush.msra.mxu3 %v1429_v21 }
  0x11   :  { %1132 = vmatmul.msk.f32.vlgmr.msra.gmra.mxu2 %vm182_vm1, %v1439_v22  ;;  %1133 = vmatmul.msk.f32.vlgmr.msra.gmra.mxu3 %vm182_vm1, %v1439_v22 }
  0x12   :  { %302 = vmatpush.msrb.mxu2 %v1321_v0  ;;  %322 = vmatpush.msrb.mxu3 %v1326_v1 }
  0x13   :  { %616 = vmatpush.msrb.mxu1 %v1348_v5  ;;  %596 = vmatpush.msrb.mxu0 %v1343_v4 }
  0x14   :  { %303 = vmatpush.msrb.mxu2 %v1331_v2  ;;  %323 = vmatpush.msrb.mxu3 %v1338_v3 }
  0x15   :  { %617 = vmatpush.msrb.mxu1 %v1360_v7  ;;  %597 = vmatpush.msrb.mxu0 %v1355_v6 }
  0x16   :  { %304 = vmatpush.msrb.mxu2 %v1343_v4  ;;  %324 = vmatpush.msrb.mxu3 %v1348_v5 }
  0x17   :  { %618 = vmatpush.msrb.mxu1 %v1375_v10  ;;  %598 = vmatpush.msrb.mxu0 %v1367_v8 }
  0x18   :  { %305 = vmatpush.msrb.mxu2 %v1355_v6  ;;  %325 = vmatpush.msrb.mxu3 %v1360_v7 }
  0x19   :  { %619 = vmatpush.msrb.mxu1 %v1399_v16  ;;  %599 = vmatpush.msrb.mxu0 %v1394_v15 }
  0x1a   :  { %306 = vmatpush.msrb.mxu2 %v1367_v8  ;;  %326 = vmatpush.msrb.mxu3 %v1375_v10 }
  0x1b   :  { %620 = vmatpush.msrb.mxu1 %v1416_v19  ;;  %600 = vmatpush.msrb.mxu0 %v1411_v18 }
  0x1c   :  { %307 = vmatpush.msrb.mxu2 %v1394_v15  ;;  %327 = vmatpush.msrb.mxu3 %v1399_v16 }
  0x1d   :  { %621 = vmatpush.msrb.mxu1 %v1429_v21  ;;  %601 = vmatpush.msrb.mxu0 %v1424_v20 }
  0x1e   :  { %308 = vmatpush.msrb.mxu2 %v1411_v18  ;;  %328 = vmatpush.msrb.mxu3 %v1416_v19 }
  0x1f   :  { %786 = vmatpush.msra.mxu0 %v1321_v0  ;;  %806 = vmatpush.msra.mxu1 %v1326_v1 }
  0x20   :  { %309 = vmatpush.msrb.mxu2 %v1424_v20  ;;  %329 = vmatpush.msrb.mxu3 %v1429_v21 }
  0x21   :  { %787 = vmatpush.msra.mxu0 %v1331_v2  ;;  %807 = vmatpush.msra.mxu1 %v1338_v3 }
  0x22   :  { %402 = vmatpush.msra.mxu2 %v1321_v0  ;;  %422 = vmatpush.msra.mxu3 %v1326_v1 }
  0x23   :  { %788 = vmatpush.msra.mxu0 %v1343_v4  ;;  %808 = vmatpush.msra.mxu1 %v1348_v5 }
  0x24   :  { %403 = vmatpush.msra.mxu2 %v1331_v2  ;;  %423 = vmatpush.msra.mxu3 %v1338_v3 }
  0x25   :  { %789 = vmatpush.msra.mxu0 %v1355_v6  ;;  %809 = vmatpush.msra.mxu1 %v1360_v7 }
  0x26   :  { %404 = vmatpush.msra.mxu2 %v1343_v4  ;;  %424 = vmatpush.msra.mxu3 %v1348_v5 }
  0x27   :  { %790 = vmatpush.msra.mxu0 %v1367_v8  ;;  %810 = vmatpush.msra.mxu1 %v1375_v10 }
  0x28   :  { %405 = vmatpush.msra.mxu2 %v1355_v6  ;;  %425 = vmatpush.msra.mxu3 %v1360_v7 }
  0x29   :  { %791 = vmatpush.msra.mxu0 %v1394_v15  ;;  %811 = vmatpush.msra.mxu1 %v1399_v16 }
  0x2a   :  { %406 = vmatpush.msra.mxu2 %v1367_v8  ;;  %426 = vmatpush.msra.mxu3 %v1375_v10 }
  0x2b   :  { %792 = vmatpush.msra.mxu0 %v1411_v18  ;;  %812 = vmatpush.msra.mxu1 %v1416_v19 }
  0x2c   :  { %407 = vmatpush.msra.mxu2 %v1394_v15  ;;  %427 = vmatpush.msra.mxu3 %v1399_v16 }
  0x2d   :  { %793 = vmatpush.msra.mxu0 %v1424_v20  ;;  %813 = vmatpush.msra.mxu1 %v1429_v21 }
  0x2e   :  { %408 = vmatpush.msra.mxu2 %v1411_v18  ;;  %428 = vmatpush.msra.mxu3 %v1416_v19 }
  0x2f   :  { %1115 = vmatmul.msk.f32.gmra.mxu0 %vm45_vm0, %v27_v23  ;;  %1124 = vmatmul.msk.f32.gmra.mxu1 %vm45_vm0, %v27_v23 }
  0x30   :  { %409 = vmatpush.msra.mxu2 %v1424_v20  ;;  %429 = vmatpush.msra.mxu3 %v1429_v21 }
  0x7d   :  { %v270_v63 = vpop.permute.xlu0 %269 }
  0x86   :  { %v90_v26 = vpop.f32.mrf.mxu0 }
  0x87   :  { %v91_v28 = vadd.f32 %v90_v26, %v1514_v24  ;;  %v179_v26 = vlaneseq }
  0x88   :  { %v134_v27 = vpop.f32.mrf.mxu1 }
  0x89   :  { %v135_v29 = vadd.f32 %v134_v27, %v1516_v25  ;;  %v1528_v27 = vand.u32 127, %v179_v26 }
  0x8b   :  { %vm181_vm10 = vcmp.lt.s32.totalorder %v1528_v27, 32 }
  0x94   :  { %v203_v30 = vpop.f32.mrf.mxu2  ;;  %v223_v31 = vpop.f32.mrf.mxu3 }
  0x95   :  { %v226_v32 = vadd.f32 %v203_v30, %v91_v28  ;;  %v227_v33 = vadd.f32 %v223_v31, %v135_v29 }
  0x97   :  { %v1134_v34 = vmul.f32 -1.442695, %v226_v32  ;;  %v1135_v35 = vmul.f32 -1.442695, %v227_v33 }
  0x99   :  { %1180 = vpow2.f32 %v1134_v34 }
  0x9a   :  { %1182 = vpow2.f32 %v1135_v35 }
  0x9f   :  { %v1181_v36 = vpop.eup %1180 }
  0xa0   :  { %v1183_v37 = vpop.eup %1182  ;;  %v234_v38 = vadd.f32 1.0, %v1181_v36 }
  0xa1   :  { %v235_v39 = vadd.f32 1.0, %v1183_v37 }
  0xa2   :  { %1184 = vrcp.f32 %v234_v38  ;;  %v247_v52 = vand.u32 2147483648, %v234_v38  ;;  %vm241_vm6 = vweird.f32 %v234_v38  ;;  %v245_v54 = vand.u32 2147483647, %v234_v38 }
  0xa3   :  { %1186 = vrcp.f32 %v235_v39  ;;  %v262_v47 = vand.u32 2147483648, %v235_v39  ;;  %v260_v49 = vand.u32 2147483647, %v235_v39  ;;  %vm256_vm4 = vweird.f32 %v235_v39 }
  0xa4   :  { %v248_v59 = vor.u32 1.1754944e-38, %v247_v52  ;;  %vm246_vm9 = vcmp.eq.f32.partialorder %v245_v54, 8.507059e+37 }
  0xa5   :  { %v263_v53 = vor.u32 1.1754944e-38, %v262_v47  ;;  %vm261_vm7 = vcmp.eq.f32.partialorder %v260_v49, 8.507059e+37 }
  0xa8   :  { %v1185_v40 = vpop.eup %1184 }
  0xa9   :  { %v1187_v41 = vpop.eup %1186  ;;  %v237_v42 = vmul.f32 %v1185_v40, %v234_v38  ;;  %vm242_vm3 = vweird.f32 %v1185_v40 }
  0xaa   :  { %v252_v43 = vmul.f32 %v1187_v41, %v235_v39  ;;  %vm257_vm2 = vweird.f32 %v1187_v41  ;;  %vm243_vm8 = vmor %vm241_vm6, %vm242_vm3 }
  0xab   :  { %v238_v44 = vsub.f32 1.0, %v237_v42  ;;  %vm258_vm5 = vmor %vm256_vm4, %vm257_vm2 }
  0xac   :  { %v253_v45 = vsub.f32 1.0, %v252_v43  ;;  %v137_v31 = vpop.f32.mrf.mxu1 }
  0xad   :  { %v239_v46 = vmul.f32 %v1185_v40, %v238_v44  ;;  %v138_v33 = vadd.f32 %v137_v31, %v1516_v25 }
  0xae   :  { %v254_v48 = vmul.f32 %v1187_v41, %v253_v45 }
  0xaf   :  { %v240_v50 = vadd.f32 %v1185_v40, %v239_v46 }
  0xb0   :  { %v255_v51 = vadd.f32 %v1187_v41, %v254_v48 }
  0xb1   :  { %v244_v57 = vsel %vm243_vm8, %v1185_v40, %v240_v50 }
  0xb2   :  { %v259_v55 = vsel %vm258_vm5, %v1187_v41, %v255_v51  ;;  %v249_v61 = vsel %vm246_vm9, %v248_v59, %v244_v57 }
  0xb3   :  { %v264_v56 = vsel %vm261_vm7, %v263_v53, %v259_v55  ;;  %v272_v9 = vmul.f32 %v270_v63, %v249_v61 }
  0xb4   :  { %v266_v58 = vmul.f32 2.0, %v264_v56 }
  0xb6   :  { %v1136_v60 = vadd.f32 -1.0, %v266_v58 }
  0xb8   :  { %v273_v62 = vmul.f32 %v1136_v60, %v249_v61 }
  0xba   :  { %275 = vrot.lane.b32.xlu0 %v273_v62, %s1270_s25 }
 0x12c   :  { %v276_v11 = vpop.permute.xlu0 %275 }
 0x12d   :  { %v278_v12 = vadd.f32 %v276_v11, %v272_v9 }
 0x12f   :  { %1188 = vtanh.f32 %v278_v12 }
 0x135   :  { %v1189_v13 = vpop.eup %1188 }
 0x136   :  { %v280_v14 = vmul.f32 %v1189_v13, %v264_v56 }
 0x138   :  { %287 = vrot.lane.b32.xlu1 %v280_v14, %s1270_s25 }
 0x140   :  { %282 = vrot.lane.b32.xlu1 %v278_v12, %s1270_s25 }
 0x1aa   :  { %v288_v28 = vpop.permute.xlu1 %287 }
 0x1ab   :  { %v290_v29 = vsel %vm181_vm10, %v288_v28, %v1439_v22 }
 0x1ac   :  { %1137 = vmatmul.msk.f32.vlgmr.msrb.gmra.mxu2 %vm182_vm1, %v290_v29  ;;  %1138 = vmatmul.msk.f32.vlgmr.msrb.gmra.mxu3 %vm182_vm1, %v290_v29 }
 0x1ad   :  { %498 = vmatpush.msrb.mxu2 %v1321_v0  ;;  %518 = vmatpush.msrb.mxu3 %v1326_v1 }
 0x1af   :  { %499 = vmatpush.msrb.mxu2 %v1331_v2  ;;  %519 = vmatpush.msrb.mxu3 %v1338_v3 }
 0x1b1   :  { %500 = vmatpush.msrb.mxu2 %v1343_v4  ;;  %520 = vmatpush.msrb.mxu3 %v1348_v5 }
 0x1b2   :  { %v283_v30 = vpop.permute.xlu1 %282 }
 0x1b3   :  { %v285_v22 = vsel %vm181_vm10, %v283_v30, %v1406_v17  ;;  %501 = vmatpush.msrb.mxu2 %v1355_v6  ;;  %521 = vmatpush.msrb.mxu3 %v1360_v7  ;;  %v93_v17 = vpop.f32.mrf.mxu0  ;;  %v28_v30 = vld [vmem:[%s1778_s0 + $0x10] sm:$0xff] }
 0x1b4   :  { %377 = vrot.lane.b32.xlu2 %v285_v22, %s1270_s25  ;;  %v94_v32 = vadd.f32 %v93_v17, %v1514_v24  ;;  %1116 = vmatmul.msk.f32.gmra.mxu0 %vm45_vm0, %v28_v30 }
 0x1b5   :  { %502 = vmatpush.msrb.mxu2 %v1367_v8  ;;  %522 = vmatpush.msrb.mxu3 %v1375_v10 }
 0x1b6   :  { %1125 = vmatmul.msk.f32.gmra.mxu1 %vm45_vm0, %v28_v30 }
 0x1b7   :  { %503 = vmatpush.msrb.mxu2 %v1394_v15  ;;  %523 = vmatpush.msrb.mxu3 %v1399_v16 }
 0x1b9   :  { %504 = vmatpush.msrb.mxu2 %v1411_v18  ;;  %524 = vmatpush.msrb.mxu3 %v1416_v19 }
 0x1bb   :  { %505 = vmatpush.msrb.mxu2 %v1424_v20  ;;  %525 = vmatpush.msrb.mxu3 %v1429_v21 }
 0x20e   :  { %v378_v13 = vpop.permute.xlu2 %377 }
 0x22f   :  { %v311_v34 = vpop.f32.mrf.mxu2  ;;  %v331_v35 = vpop.f32.mrf.mxu3 }
 0x230   :  { %v334_v36 = vadd.f32 %v311_v34, %v94_v32  ;;  %v335_v37 = vadd.f32 %v331_v35, %v138_v33 }
 0x231   :  { %v96_v17 = vpop.f32.mrf.mxu0 }
 0x232   :  { %v1139_v38 = vmul.f32 -1.442695, %v334_v36  ;;  %v1140_v39 = vmul.f32 -1.442695, %v335_v37  ;;  %v97_v32 = vadd.f32 %v96_v17, %v1514_v24 }
 0x233   :  { %v140_v31 = vpop.f32.mrf.mxu1 }
 0x234   :  { %1190 = vpow2.f32 %v1139_v38  ;;  %v141_v33 = vadd.f32 %v140_v31, %v1516_v25 }
 0x235   :  { %1192 = vpow2.f32 %v1140_v39 }
 0x23a   :  { %v1191_v40 = vpop.eup %1190 }
 0x23b   :  { %v1193_v41 = vpop.eup %1192  ;;  %v342_v42 = vadd.f32 1.0, %v1191_v40 }
 0x23c   :  { %v343_v43 = vadd.f32 1.0, %v1193_v41 }
 0x23d   :  { %1194 = vrcp.f32 %v342_v42  ;;  %v355_v56 = vand.u32 2147483648, %v342_v42  ;;  %vm349_vm15 = vweird.f32 %v342_v42  ;;  %v353_v58 = vand.u32 2147483647, %v342_v42 }
 0x23e   :  { %1196 = vrcp.f32 %v343_v43  ;;  %v370_v51 = vand.u32 2147483648, %v343_v43  ;;  %v368_v53 = vand.u32 2147483647, %v343_v43  ;;  %vm364_vm13 = vweird.f32 %v343_v43 }
 0x23f   :  { %v356_v63 = vor.u32 1.1754944e-38, %v355_v56  ;;  %vm354_vm4 = vcmp.eq.f32.partialorder %v353_v58, 8.507059e+37 }
 0x240   :  { %v371_v57 = vor.u32 1.1754944e-38, %v370_v51  ;;  %vm369_vm2 = vcmp.eq.f32.partialorder %v368_v53, 8.507059e+37 }
 0x243   :  { %v1195_v44 = vpop.eup %1194 }
 0x244   :  { %v1197_v45 = vpop.eup %1196  ;;  %v345_v46 = vmul.f32 %v1195_v44, %v342_v42  ;;  %vm350_vm12 = vweird.f32 %v1195_v44 }
 0x245   :  { %v360_v47 = vmul.f32 %v1197_v45, %v343_v43  ;;  %vm365_vm11 = vweird.f32 %v1197_v45  ;;  %vm351_vm3 = vmor %vm349_vm15, %vm350_vm12 }
 0x246   :  { %v346_v48 = vsub.f32 1.0, %v345_v46  ;;  %vm366_vm14 = vmor %vm364_vm13, %vm365_vm11 }
 0x247   :  { %v361_v49 = vsub.f32 1.0, %v360_v47 }
 0x248   :  { %v347_v50 = vmul.f32 %v1195_v44, %v346_v48 }
 0x249   :  { %v362_v52 = vmul.f32 %v1197_v45, %v361_v49 }
 0x24a   :  { %v348_v54 = vadd.f32 %v1195_v44, %v347_v50 }
 0x24b   :  { %v363_v55 = vadd.f32 %v1197_v45, %v362_v52 }
 0x24c   :  { %v352_v61 = vsel %vm351_vm3, %v1195_v44, %v348_v54 }
 0x24d   :  { %v367_v59 = vsel %vm366_vm14, %v1197_v45, %v363_v55  ;;  %v357_v11 = vsel %vm354_vm4, %v356_v63, %v352_v61 }
 0x24e   :  { %v372_v60 = vsel %vm369_vm2, %v371_v57, %v367_v59  ;;  %v380_v14 = vmul.f32 %v378_v13, %v357_v11 }
 0x24f   :  { %v374_v62 = vmul.f32 2.0, %v372_v60 }
 0x251   :  { %v1141_v9 = vadd.f32 -1.0, %v374_v62 }
 0x253   :  { %v381_v12 = vmul.f32 %v1141_v9, %v357_v11 }
 0x255   :  { %383 = vrot.lane.b32.xlu2 %v381_v12, %s1270_s25 }
 0x2af   :  { %v384_v23 = vpop.permute.xlu2 %383 }
 0x2b0   :  { %v1559_v26 = vadd.f32 %v384_v23, %v380_v14 }
 0x2b2   :  { %1198 = vtanh.f32 %v1559_v26 }
 0x2b8   :  { %v1199_v28 = vpop.eup %1198 }
 0x2b9   :  { %v1562_v29 = vmul.f32 %v1199_v28, %v372_v60 }
 0x2bb   :  { %390 = vrot.lane.b32.xlu0 %v1562_v29, %s1270_s25 }
 0x32d   :  { %v391_v22 = vpop.permute.xlu0 %390 }
 0x32e   :  { %1142 = vmatmul.msk.f32.vlgmr.msra.gmra.mxu2 %vm182_vm1, %v391_v22  ;;  %1143 = vmatmul.msk.f32.vlgmr.msra.gmra.mxu3 %vm182_vm1, %v391_v22  ;;  %v29_v22 = vld [vmem:[%s1778_s0 + $0x18] sm:$0xff] }
 0x32f   :  { %690 = vmatpush.msra.mxu2 %v1321_v0  ;;  %710 = vmatpush.msra.mxu3 %v1326_v1 }
 0x330   :  { %1117 = vmatmul.msk.f32.gmra.mxu0 %vm45_vm0, %v29_v22  ;;  %1126 = vmatmul.msk.f32.gmra.mxu1 %vm45_vm0, %v29_v22 }
 0x331   :  { %691 = vmatpush.msra.mxu2 %v1331_v2  ;;  %711 = vmatpush.msra.mxu3 %v1338_v3 }
 0x333   :  { %692 = vmatpush.msra.mxu2 %v1343_v4  ;;  %712 = vmatpush.msra.mxu3 %v1348_v5 }
 0x335   :  { %693 = vmatpush.msra.mxu2 %v1355_v6  ;;  %713 = vmatpush.msra.mxu3 %v1360_v7 }
 0x337   :  { %694 = vmatpush.msra.mxu2 %v1367_v8  ;;  %714 = vmatpush.msra.mxu3 %v1375_v10 }
 0x339   :  { %695 = vmatpush.msra.mxu2 %v1394_v15  ;;  %715 = vmatpush.msra.mxu3 %v1399_v16 }
 0x33b   :  { %696 = vmatpush.msra.mxu2 %v1411_v18  ;;  %716 = vmatpush.msra.mxu3 %v1416_v19 }
 0x33d   :  { %697 = vmatpush.msra.mxu2 %v1424_v20  ;;  %717 = vmatpush.msra.mxu3 %v1429_v21 }
 0x3ad   :  { %v143_v31 = vpop.f32.mrf.mxu1 }
 0x3b1   :  { %v411_v34 = vpop.f32.mrf.mxu2  ;;  %v431_v35 = vpop.f32.mrf.mxu3 }
 0x3b2   :  { %v434_v36 = vadd.f32 %v411_v34, %v97_v32  ;;  %v435_v37 = vadd.f32 %v431_v35, %v141_v33  ;;  %v144_v33 = vadd.f32 %v143_v31, %v1516_v25  ;;  %v33_v31 = vld [vmem:[%s1778_s0 + $0x38] sm:$0xff] }
 0x3b4   :  { %v1144_v38 = vmul.f32 -1.442695, %v434_v36  ;;  %v1145_v39 = vmul.f32 -1.442695, %v435_v37 }
 0x3b6   :  { %1200 = vpow2.f32 %v1144_v38 }
 0x3b7   :  { %1202 = vpow2.f32 %v1145_v39 }
 0x3bc   :  { %v1201_v40 = vpop.eup %1200 }
 0x3bd   :  { %v1203_v41 = vpop.eup %1202  ;;  %v442_v42 = vadd.f32 1.0, %v1201_v40 }
 0x3be   :  { %v443_v43 = vadd.f32 1.0, %v1203_v41 }
 0x3bf   :  { %1204 = vrcp.f32 %v442_v42  ;;  %v455_v56 = vand.u32 2147483648, %v442_v42  ;;  %vm449_vm9 = vweird.f32 %v442_v42  ;;  %v453_v58 = vand.u32 2147483647, %v442_v42 }
 0x3c0   :  { %1206 = vrcp.f32 %v443_v43  ;;  %v470_v51 = vand.u32 2147483648, %v443_v43  ;;  %v468_v53 = vand.u32 2147483647, %v443_v43  ;;  %vm464_vm7 = vweird.f32 %v443_v43 }
 0x3c1   :  { %v456_v63 = vor.u32 1.1754944e-38, %v455_v56  ;;  %vm454_vm13 = vcmp.eq.f32.partialorder %v453_v58, 8.507059e+37 }
 0x3c2   :  { %v471_v57 = vor.u32 1.1754944e-38, %v470_v51  ;;  %vm469_vm11 = vcmp.eq.f32.partialorder %v468_v53, 8.507059e+37 }
 0x3c5   :  { %v1205_v44 = vpop.eup %1204 }
 0x3c6   :  { %v1207_v45 = vpop.eup %1206  ;;  %v445_v46 = vmul.f32 %v1205_v44, %v442_v42  ;;  %vm450_vm6 = vweird.f32 %v1205_v44 }
 0x3c7   :  { %v460_v47 = vmul.f32 %v1207_v45, %v443_v43  ;;  %vm465_vm5 = vweird.f32 %v1207_v45  ;;  %vm451_vm12 = vmor %vm449_vm9, %vm450_vm6 }
 0x3c8   :  { %v446_v48 = vsub.f32 1.0, %v445_v46  ;;  %vm466_vm8 = vmor %vm464_vm7, %vm465_vm5 }
 0x3c9   :  { %v461_v49 = vsub.f32 1.0, %v460_v47 }
 0x3ca   :  { %v447_v50 = vmul.f32 %v1205_v44, %v446_v48 }
 0x3cb   :  { %v462_v52 = vmul.f32 %v1207_v45, %v461_v49 }
 0x3cc   :  { %v448_v54 = vadd.f32 %v1205_v44, %v447_v50 }
 0x3cd   :  { %v463_v55 = vadd.f32 %v1207_v45, %v462_v52 }
 0x3ce   :  { %v452_v61 = vsel %vm451_vm12, %v1205_v44, %v448_v54 }
 0x3cf   :  { %v467_v59 = vsel %vm466_vm8, %v1207_v45, %v463_v55  ;;  %v457_v11 = vsel %vm454_vm13, %v456_v63, %v452_v61 }
 0x3d0   :  { %v472_v60 = vsel %vm469_vm11, %v471_v57, %v467_v59  ;;  %v476_v13 = vmul.f32 %v457_v11, %v1559_v26  ;;  %v99_v26 = vpop.f32.mrf.mxu0 }
 0x3d1   :  { %v474_v62 = vmul.f32 2.0, %v472_v60  ;;  %v100_v32 = vadd.f32 %v99_v26, %v1514_v24 }
 0x3d3   :  { %v1146_v9 = vadd.f32 -1.0, %v474_v62 }
 0x3d5   :  { %v477_v12 = vmul.f32 %v1146_v9, %v457_v11 }
 0x3d7   :  { %479 = vrot.lane.b32.xlu1 %v477_v12, %s1270_s25 }
 0x449   :  { %v480_v14 = vpop.permute.xlu1 %479 }
 0x44a   :  { %v1593_v23 = vadd.f32 %v480_v14, %v476_v13  ;;  %v30_v13 = vld [vmem:[%s1778_s0 + $0x20] sm:$0xff]  ;;  %v31_v14 = vld [vmem:[%s1778_s0 + $0x28] sm:$0xff] }
 0x44b   :  { %1118 = vmatmul.msk.f32.gmra.mxu0 %vm45_vm0, %v30_v13  ;;  %1127 = vmatmul.msk.f32.gmra.mxu1 %vm45_vm0, %v30_v13 }
 0x44c   :  { %1208 = vtanh.f32 %v1593_v23 }
 0x452   :  { %v1209_v28 = vpop.eup %1208 }
 0x453   :  { %v484_v30 = vmul.f32 %v1209_v28, %v472_v60  ;;  %1119 = vmatmul.msk.f32.gmra.mxu0 %vm45_vm0, %v31_v14  ;;  %1128 = vmatmul.msk.f32.gmra.mxu1 %vm45_vm0, %v31_v14  ;;  %v32_v28 = vld [vmem:[%s1778_s0 + $0x30] sm:$0xff] }
 0x455   :  { %486 = vrot.lane.b32.xlu2 %v484_v30, %s1270_s25 }
 0x45b   :  { %1120 = vmatmul.msk.f32.gmra.mxu0 %vm45_vm0, %v32_v28  ;;  %1129 = vmatmul.msk.f32.gmra.mxu1 %vm45_vm0, %v32_v28 }
 0x463   :  { %1121 = vmatmul.msk.f32.gmra.mxu0 %vm45_vm0, %v33_v31  ;;  %1130 = vmatmul.msk.f32.gmra.mxu1 %vm45_vm0, %v33_v31 }
 0x4af   :  { %v1602_v17 = vpop.permute.xlu2 %486 }
 0x4b0   :  { %1147 = vmatmul.msk.f32.vlgmr.msrb.gmra.mxu2 %vm182_vm1, %v1602_v17  ;;  %1148 = vmatmul.msk.f32.vlgmr.msrb.gmra.mxu3 %vm182_vm1, %v1602_v17 }
 0x4b1   :  { %882 = vmatpush.msrb.mxu2 %v1321_v0  ;;  %902 = vmatpush.msrb.mxu3 %v1326_v1 }
 0x4b3   :  { %883 = vmatpush.msrb.mxu2 %v1331_v2  ;;  %903 = vmatpush.msrb.mxu3 %v1338_v3 }
 0x4b5   :  { %884 = vmatpush.msrb.mxu2 %v1343_v4  ;;  %904 = vmatpush.msrb.mxu3 %v1348_v5 }
 0x4b7   :  { %885 = vmatpush.msrb.mxu2 %v1355_v6  ;;  %905 = vmatpush.msrb.mxu3 %v1360_v7 }
 0x4b9   :  { %886 = vmatpush.msrb.mxu2 %v1367_v8  ;;  %906 = vmatpush.msrb.mxu3 %v1375_v10 }
 0x4bb   :  { %887 = vmatpush.msrb.mxu2 %v1394_v15  ;;  %907 = vmatpush.msrb.mxu3 %v1399_v16 }
 0x4bd   :  { %888 = vmatpush.msrb.mxu2 %v1411_v18  ;;  %908 = vmatpush.msrb.mxu3 %v1416_v19 }
 0x4bf   :  { %889 = vmatpush.msrb.mxu2 %v1424_v20  ;;  %909 = vmatpush.msrb.mxu3 %v1429_v21 }
 0x533   :  { %v507_v34 = vpop.f32.mrf.mxu2  ;;  %v527_v35 = vpop.f32.mrf.mxu3 }
 0x534   :  { %v530_v36 = vadd.f32 %v507_v34, %v100_v32  ;;  %v531_v37 = vadd.f32 %v527_v35, %v144_v33 }
 0x536   :  { %v1149_v38 = vmul.f32 -1.442695, %v530_v36  ;;  %v1150_v39 = vmul.f32 -1.442695, %v531_v37 }
 0x538   :  { %1210 = vpow2.f32 %v1149_v38 }
 0x539   :  { %1212 = vpow2.f32 %v1150_v39 }
 0x53e   :  { %v1211_v40 = vpop.eup %1210 }
 0x53f   :  { %v1213_v41 = vpop.eup %1212  ;;  %v538_v42 = vadd.f32 1.0, %v1211_v40 }
 0x540   :  { %v539_v43 = vadd.f32 1.0, %v1213_v41 }
 0x541   :  { %1214 = vrcp.f32 %v538_v42  ;;  %v551_v56 = vand.u32 2147483648, %v538_v42  ;;  %vm545_vm4 = vweird.f32 %v538_v42  ;;  %v549_v58 = vand.u32 2147483647, %v538_v42 }
 0x542   :  { %1216 = vrcp.f32 %v539_v43  ;;  %v566_v51 = vand.u32 2147483648, %v539_v43  ;;  %v564_v53 = vand.u32 2147483647, %v539_v43  ;;  %vm560_vm2 = vweird.f32 %v539_v43 }
 0x543   :  { %v552_v63 = vor.u32 1.1754944e-38, %v551_v56  ;;  %vm550_vm7 = vcmp.eq.f32.partialorder %v549_v58, 8.507059e+37 }
 0x544   :  { %v567_v57 = vor.u32 1.1754944e-38, %v566_v51  ;;  %vm565_vm5 = vcmp.eq.f32.partialorder %v564_v53, 8.507059e+37 }
 0x547   :  { %v1215_v44 = vpop.eup %1214 }
 0x548   :  { %v1217_v45 = vpop.eup %1216  ;;  %v541_v46 = vmul.f32 %v1215_v44, %v538_v42  ;;  %vm546_vm15 = vweird.f32 %v1215_v44 }
 0x549   :  { %v556_v47 = vmul.f32 %v1217_v45, %v539_v43  ;;  %vm561_vm14 = vweird.f32 %v1217_v45  ;;  %vm547_vm6 = vmor %vm545_vm4, %vm546_vm15 }
 0x54a   :  { %v542_v48 = vsub.f32 1.0, %v541_v46  ;;  %vm562_vm3 = vmor %vm560_vm2, %vm561_vm14 }
 0x54b   :  { %v557_v49 = vsub.f32 1.0, %v556_v47 }
 0x54c   :  { %v543_v50 = vmul.f32 %v1215_v44, %v542_v48 }
 0x54d   :  { %v558_v52 = vmul.f32 %v1217_v45, %v557_v49 }
 0x54e   :  { %v544_v54 = vadd.f32 %v1215_v44, %v543_v50 }
 0x54f   :  { %v559_v55 = vadd.f32 %v1217_v45, %v558_v52 }
 0x550   :  { %v548_v61 = vsel %vm547_vm6, %v1215_v44, %v544_v54 }
 0x551   :  { %v563_v59 = vsel %vm562_vm3, %v1217_v45, %v559_v55  ;;  %v553_v11 = vsel %vm550_vm7, %v552_v63, %v548_v61 }
 0x552   :  { %v568_v60 = vsel %vm565_vm5, %v567_v57, %v563_v59  ;;  %v572_v30 = vmul.f32 %v553_v11, %v1593_v23  ;;  %v34_v23 = vld [vmem:[%s1778_s0 + $0x40] sm:$0xff]  ;;  %s1271_s0 = smov 32  }
 0x553   :  { %v570_v62 = vmul.f32 2.0, %v568_v60  ;;  %1122 = vmatmul.msk.f32.gmra.mxu0 %vm45_vm0, %v34_v23  ;;  %1131 = vmatmul.msk.f32.gmra.mxu1 %vm45_vm0, %v34_v23 }
 0x555   :  { %v1151_v9 = vadd.f32 -1.0, %v570_v62 }
 0x557   :  { %v573_v12 = vmul.f32 %v1151_v9, %v553_v11 }
 0x559   :  { %575 = vrot.lane.b32.xlu0 %v573_v12, %s1270_s25 }
 0x5cb   :  { %v576_v22 = vpop.permute.xlu0 %575 }
 0x5cc   :  { %v1643_v26 = vadd.f32 %v576_v22, %v572_v30 }
 0x5ce   :  { %1218 = vtanh.f32 %v1643_v26 }
 0x5d4   :  { %v1219_v32 = vpop.eup %1218 }
 0x5d5   :  { %v1651_v33 = vmul.f32 %v1219_v32, %v568_v60 }
 0x5d7   :  { %582 = vrot.lane.b32.xlu1 %v1651_v33, %s1270_s25 }
 0x649   :  { %v583_v34 = vpop.permute.xlu1 %582 }
 0x64a   :  { %1152 = vmatmul.msk.f32.vlgmr.msrb.gmra.mxu0 %vm182_vm1, %v583_v34  ;;  %1153 = vmatmul.msk.f32.vlgmr.msrb.gmra.mxu1 %vm182_vm1, %v583_v34 }
 0x64b   :  { %978 = vmatpush.msrb.mxu0 %v1321_v0  ;;  %998 = vmatpush.msrb.mxu1 %v1326_v1  ;;  %v102_v0 = vpop.f32.mrf.mxu0  ;;  %v146_v1 = vpop.f32.mrf.mxu1 }
 0x64d   :  { %979 = vmatpush.msrb.mxu0 %v1331_v2  ;;  %999 = vmatpush.msrb.mxu1 %v1338_v3 }
 0x64f   :  { %980 = vmatpush.msrb.mxu0 %v1343_v4  ;;  %1000 = vmatpush.msrb.mxu1 %v1348_v5 }
 0x651   :  { %981 = vmatpush.msrb.mxu0 %v1355_v6  ;;  %1001 = vmatpush.msrb.mxu1 %v1360_v7 }
 0x653   :  { %982 = vmatpush.msrb.mxu0 %v1367_v8  ;;  %1002 = vmatpush.msrb.mxu1 %v1375_v10  ;;  %v1678_v2 = vpop.f32.mrf.mxu0  ;;  %v1680_v3 = vpop.f32.mrf.mxu1 }
 0x654   :  { %v106_v30 = vadd.f32 %v1678_v2, %v1514_v24  ;;  %v150_v22 = vadd.f32 %v1680_v3, %v1516_v25 }
 0x655   :  { %983 = vmatpush.msrb.mxu0 %v1394_v15  ;;  %1003 = vmatpush.msrb.mxu1 %v1399_v16  ;;  %v103_v15 = vadd.f32 %v102_v0, %v1514_v24  ;;  %v147_v16 = vadd.f32 %v146_v1, %v1516_v25 }
 0x657   :  { %984 = vmatpush.msrb.mxu0 %v1411_v18  ;;  %1004 = vmatpush.msrb.mxu1 %v1416_v19 }
 0x659   :  { %985 = vmatpush.msrb.mxu0 %v1424_v20  ;;  %1005 = vmatpush.msrb.mxu1 %v1429_v21 }
 0x65b   :  { %v1682_v4 = vpop.f32.mrf.mxu0  ;;  %v1684_v5 = vpop.f32.mrf.mxu1 }
 0x663   :  { %v1686_v6 = vpop.f32.mrf.mxu0  ;;  %v1688_v7 = vpop.f32.mrf.mxu1 }
 0x66b   :  { %v1690_v8 = vpop.f32.mrf.mxu0  ;;  %v1692_v10 = vpop.f32.mrf.mxu1 }
 0x6c7   :  { %v603_v18 = vpop.f32.mrf.mxu0  ;;  %v623_v19 = vpop.f32.mrf.mxu1 }
 0x6c8   :  { %v626_v20 = vadd.f32 %v603_v18, %v103_v15  ;;  %v627_v21 = vadd.f32 %v623_v19, %v147_v16 }
 0x6ca   :  { %v1154_v35 = vmul.f32 -1.442695, %v626_v20  ;;  %v1155_v36 = vmul.f32 -1.442695, %v627_v21 }
 0x6cc   :  { %1220 = vpow2.f32 %v1154_v35 }
 0x6cd   :  { %1222 = vpow2.f32 %v1155_v36 }
 0x6d2   :  { %v1221_v37 = vpop.eup %1220 }
 0x6d3   :  { %v1223_v38 = vpop.eup %1222  ;;  %v634_v39 = vadd.f32 1.0, %v1221_v37 }
 0x6d4   :  { %v635_v40 = vadd.f32 1.0, %v1223_v38 }
 0x6d5   :  { %1224 = vrcp.f32 %v634_v39  ;;  %v647_v53 = vand.u32 2147483648, %v634_v39  ;;  %vm641_vm12 = vweird.f32 %v634_v39  ;;  %v645_v55 = vand.u32 2147483647, %v634_v39 }
 0x6d6   :  { %1226 = vrcp.f32 %v635_v40  ;;  %v662_v48 = vand.u32 2147483648, %v635_v40  ;;  %v660_v50 = vand.u32 2147483647, %v635_v40  ;;  %vm656_vm9 = vweird.f32 %v635_v40 }
 0x6d7   :  { %v648_v60 = vor.u32 1.1754944e-38, %v647_v53  ;;  %vm646_vm15 = vcmp.eq.f32.partialorder %v645_v55, 8.507059e+37 }
 0x6d8   :  { %v663_v54 = vor.u32 1.1754944e-38, %v662_v48  ;;  %vm661_vm13 = vcmp.eq.f32.partialorder %v660_v50, 8.507059e+37 }
 0x6db   :  { %v1225_v41 = vpop.eup %1224 }
 0x6dc   :  { %v1227_v42 = vpop.eup %1226  ;;  %v637_v43 = vmul.f32 %v1225_v41, %v634_v39  ;;  %vm642_vm8 = vweird.f32 %v1225_v41 }
 0x6dd   :  { %v652_v44 = vmul.f32 %v1227_v42, %v635_v40  ;;  %vm657_vm0 = vweird.f32 %v1227_v42  ;;  %vm643_vm14 = vmor %vm641_vm12, %vm642_vm8 }
 0x6de   :  { %v638_v45 = vsub.f32 1.0, %v637_v43  ;;  %vm658_vm11 = vmor %vm656_vm9, %vm657_vm0 }
 0x6df   :  { %v653_v46 = vsub.f32 1.0, %v652_v44 }
 0x6e0   :  { %v639_v47 = vmul.f32 %v1225_v41, %v638_v45 }
 0x6e1   :  { %v654_v49 = vmul.f32 %v1227_v42, %v653_v46 }
 0x6e2   :  { %v640_v51 = vadd.f32 %v1225_v41, %v639_v47 }
 0x6e3   :  { %v655_v52 = vadd.f32 %v1227_v42, %v654_v49 }
 0x6e4   :  { %v644_v58 = vsel %vm643_vm14, %v1225_v41, %v640_v51 }
 0x6e5   :  { %v659_v56 = vsel %vm658_vm11, %v1227_v42, %v655_v52  ;;  %v649_v62 = vsel %vm646_vm15, %v648_v60, %v644_v58  ;;  %v153_v60 = vadd.f32 %v1684_v5, %v1516_v25 }
 0x6e6   :  { %v664_v57 = vsel %vm661_vm13, %v663_v54, %v659_v56  ;;  %v668_v9 = vmul.f32 %v649_v62, %v1643_v26 }
 0x6e7   :  { %v666_v59 = vmul.f32 2.0, %v664_v57 }
 0x6e9   :  { %v1156_v61 = vadd.f32 -1.0, %v666_v59  ;;  %v109_v59 = vadd.f32 %v1682_v4, %v1514_v24 }
 0x6eb   :  { %v669_v63 = vmul.f32 %v1156_v61, %v649_v62 }
 0x6ed   :  { %671 = vrot.lane.b32.xlu2 %v669_v63, %s1270_s25 }
 0x747   :  { %v672_v11 = vpop.permute.xlu2 %671 }
 0x748   :  { %v674_v12 = vadd.f32 %v672_v11, %v668_v9 }
 0x74a   :  { %1228 = vtanh.f32 %v674_v12 }
 0x750   :  { %v1229_v13 = vpop.eup %1228 }
 0x751   :  { %v1698_v14 = vmul.f32 %v1229_v13, %v664_v57 }
 0x753   :  { %678 = vrot.lane.b32.xlu0 %v1698_v14, %s1270_s25 }
 0x7c5   :  { %v679_v28 = vpop.permute.xlu0 %678 }
 0x7c6   :  { %1157 = vmatmul.msk.f32.vlgmr.msra.gmra.mxu2 %vm182_vm1, %v679_v28  ;;  %1158 = vmatmul.msk.f32.vlgmr.msra.gmra.mxu3 %vm182_vm1, %v679_v28 }
 0x849   :  { %v699_v26 = vpop.f32.mrf.mxu2  ;;  %v719_v31 = vpop.f32.mrf.mxu3 }
 0x84a   :  { %v722_v32 = vadd.f32 %v699_v26, %v106_v30  ;;  %v723_v23 = vadd.f32 %v719_v31, %v150_v22 }
 0x84c   :  { %v1159_v34 = vmul.f32 -1.442695, %v722_v32  ;;  %v1160_v0 = vmul.f32 -1.442695, %v723_v23 }
 0x84e   :  { %1230 = vpow2.f32 %v1159_v34 }
 0x84f   :  { %1232 = vpow2.f32 %v1160_v0 }
 0x854   :  { %v1231_v1 = vpop.eup %1230 }
 0x855   :  { %v1233_v15 = vpop.eup %1232  ;;  %v730_v16 = vadd.f32 1.0, %v1231_v1 }
 0x856   :  { %v731_v18 = vadd.f32 1.0, %v1233_v15 }
 0x857   :  { %1234 = vrcp.f32 %v730_v16  ;;  %v743_v42 = vand.u32 2147483648, %v730_v16  ;;  %vm737_vm6 = vweird.f32 %v730_v16  ;;  %v741_v44 = vand.u32 2147483647, %v730_v16 }
 0x858   :  { %1236 = vrcp.f32 %v731_v18  ;;  %v758_v37 = vand.u32 2147483648, %v731_v18  ;;  %v756_v39 = vand.u32 2147483647, %v731_v18  ;;  %vm752_vm4 = vweird.f32 %v731_v18 }
 0x859   :  { %v744_v49 = vor.u32 1.1754944e-38, %v743_v42  ;;  %vm742_vm8 = vcmp.eq.f32.partialorder %v741_v44, 8.507059e+37 }
 0x85a   :  { %v759_v43 = vor.u32 1.1754944e-38, %v758_v37  ;;  %vm757_vm7 = vcmp.eq.f32.partialorder %v756_v39, 8.507059e+37 }
 0x85d   :  { %v1235_v19 = vpop.eup %1234 }
 0x85e   :  { %v1237_v20 = vpop.eup %1236  ;;  %v733_v2 = vmul.f32 %v1235_v19, %v730_v16  ;;  %vm738_vm3 = vweird.f32 %v1235_v19 }
 0x85f   :  { %v748_v21 = vmul.f32 %v1237_v20, %v731_v18  ;;  %vm753_vm2 = vweird.f32 %v1237_v20  ;;  %vm739_vm0 = vmor %vm737_vm6, %vm738_vm3 }
 0x860   :  { %v734_v35 = vsub.f32 1.0, %v733_v2  ;;  %vm754_vm5 = vmor %vm752_vm4, %vm753_vm2 }
 0x861   :  { %v749_v3 = vsub.f32 1.0, %v748_v21 }
 0x862   :  { %v735_v36 = vmul.f32 %v1235_v19, %v734_v35 }
 0x863   :  { %v750_v38 = vmul.f32 %v1237_v20, %v749_v3 }
 0x864   :  { %v736_v40 = vadd.f32 %v1235_v19, %v735_v36 }
 0x865   :  { %v751_v41 = vadd.f32 %v1237_v20, %v750_v38 }
 0x866   :  { %v740_v47 = vsel %vm739_vm0, %v1235_v19, %v736_v40 }
 0x867   :  { %v755_v45 = vsel %vm754_vm5, %v1237_v20, %v751_v41  ;;  %v745_v51 = vsel %vm742_vm8, %v744_v49, %v740_v47  ;;  %v112_v47 = vadd.f32 %v1686_v6, %v1514_v24 }
 0x868   :  { %v760_v46 = vsel %vm757_vm7, %v759_v43, %v755_v45  ;;  %v764_v53 = vmul.f32 %v745_v51, %v674_v12 }
 0x869   :  { %v762_v48 = vmul.f32 2.0, %v760_v46 }
 0x86b   :  { %v1161_v50 = vadd.f32 -1.0, %v762_v48  ;;  %v156_v48 = vadd.f32 %v1688_v7, %v1516_v25 }
 0x86d   :  { %v765_v52 = vmul.f32 %v1161_v50, %v745_v51 }
 0x86f   :  { %767 = vrot.lane.b32.xlu1 %v765_v52, %s1270_s25 }
 0x8e1   :  { %v768_v54 = vpop.permute.xlu1 %767 }
 0x8e2   :  { %v770_v55 = vadd.f32 %v768_v54, %v764_v53 }
 0x8e4   :  { %1238 = vtanh.f32 %v770_v55 }
 0x8ea   :  { %v1239_v56 = vpop.eup %1238 }
 0x8eb   :  { %v1709_v57 = vmul.f32 %v1239_v56, %v760_v46 }
 0x8ed   :  { %774 = vrot.lane.b32.xlu2 %v1709_v57, %s1270_s25 }
 0x947   :  { %v775_v58 = vpop.permute.xlu2 %774 }
 0x948   :  { %1162 = vmatmul.msk.f32.vlgmr.msra.gmra.mxu0 %vm182_vm1, %v775_v58  ;;  %1163 = vmatmul.msk.f32.vlgmr.msra.gmra.mxu1 %vm182_vm1, %v775_v58 }
 0x9c5   :  { %v795_v61 = vpop.f32.mrf.mxu0  ;;  %v815_v62 = vpop.f32.mrf.mxu1 }
 0x9c6   :  { %v818_v63 = vadd.f32 %v795_v61, %v109_v59  ;;  %v819_v9 = vadd.f32 %v815_v62, %v153_v60 }
 0x9c8   :  { %v1164_v11 = vmul.f32 -1.442695, %v818_v63  ;;  %v1165_v12 = vmul.f32 -1.442695, %v819_v9 }
 0x9ca   :  { %1240 = vpow2.f32 %v1164_v11 }
 0x9cb   :  { %1242 = vpow2.f32 %v1165_v12 }
 0x9d0   :  { %v1241_v13 = vpop.eup %1240 }
 0x9d1   :  { %v1243_v28 = vpop.eup %1242  ;;  %v826_v30 = vadd.f32 1.0, %v1241_v13 }
 0x9d2   :  { %v827_v22 = vadd.f32 1.0, %v1243_v28 }
 0x9d3   :  { %1244 = vrcp.f32 %v826_v30  ;;  %v839_v19 = vand.u32 2147483648, %v826_v30  ;;  %vm833_vm14 = vweird.f32 %v826_v30  ;;  %v837_v2 = vand.u32 2147483647, %v826_v30 }
 0x9d4   :  { %1246 = vrcp.f32 %v827_v22  ;;  %v854_v0 = vand.u32 2147483648, %v827_v22  ;;  %v852_v15 = vand.u32 2147483647, %v827_v22  ;;  %vm848_vm12 = vweird.f32 %v827_v22 }
 0x9d5   :  { %v840_v37 = vor.u32 1.1754944e-38, %v839_v19  ;;  %vm838_vm3 = vcmp.eq.f32.partialorder %v837_v2, 8.507059e+37 }
 0x9d6   :  { %v855_v20 = vor.u32 1.1754944e-38, %v854_v0  ;;  %vm853_vm15 = vcmp.eq.f32.partialorder %v852_v15, 8.507059e+37 }
 0x9d9   :  { %v1245_v26 = vpop.eup %1244 }
 0x9da   :  { %v1247_v31 = vpop.eup %1246  ;;  %v829_v4 = vmul.f32 %v1245_v26, %v826_v30  ;;  %vm834_vm11 = vweird.f32 %v1245_v26 }
 0x9db   :  { %v844_v32 = vmul.f32 %v1247_v31, %v827_v22  ;;  %vm849_vm9 = vweird.f32 %v1247_v31  ;;  %vm835_vm2 = vmor %vm833_vm14, %vm834_vm11 }
 0x9dc   :  { %v830_v23 = vsub.f32 1.0, %v829_v4  ;;  %vm850_vm13 = vmor %vm848_vm12, %vm849_vm9 }
 0x9dd   :  { %v845_v5 = vsub.f32 1.0, %v844_v32 }
 0x9de   :  { %v831_v34 = vmul.f32 %v1245_v26, %v830_v23 }
 0x9df   :  { %v846_v1 = vmul.f32 %v1247_v31, %v845_v5 }
 0x9e0   :  { %v832_v16 = vadd.f32 %v1245_v26, %v831_v34 }
 0x9e1   :  { %v847_v18 = vadd.f32 %v1247_v31, %v846_v1 }
 0x9e2   :  { %v836_v3 = vsel %vm835_vm2, %v1245_v26, %v832_v16 }
 0x9e3   :  { %v851_v21 = vsel %vm850_vm13, %v1247_v31, %v847_v18  ;;  %v841_v39 = vsel %vm838_vm3, %v840_v37, %v836_v3 }
 0x9e4   :  { %v856_v35 = vsel %vm853_vm15, %v855_v20, %v851_v21  ;;  %v860_v41 = vmul.f32 %v841_v39, %v770_v55 }
 0x9e5   :  { %v858_v36 = vmul.f32 2.0, %v856_v35 }
 0x9e7   :  { %v1166_v38 = vadd.f32 -1.0, %v858_v36 }
 0x9e9   :  { %v861_v40 = vmul.f32 %v1166_v38, %v841_v39 }
 0x9eb   :  { %863 = vrot.lane.b32.xlu0 %v861_v40, %s1270_s25 }
 0xa5d   :  { %v864_v42 = vpop.permute.xlu0 %863 }
 0xa5e   :  { %v866_v43 = vadd.f32 %v864_v42, %v860_v41 }
 0xa60   :  { %1248 = vtanh.f32 %v866_v43 }
 0xa66   :  { %v1249_v44 = vpop.eup %1248 }
 0xa67   :  { %v868_v45 = vmul.f32 %v1249_v44, %v856_v35  ;;  %v159_v35 = vadd.f32 %v1692_v10, %v1516_v25 }
 0xa69   :  { %870 = vrot.lane.b32.xlu1 %v868_v45, %s1270_s25 }
 0xadb   :  { %v1721_v46 = vpop.permute.xlu1 %870 }
 0xadc   :  { %1167 = vmatmul.msk.f32.vlgmr.msrb.gmra.mxu2 %vm182_vm1, %v1721_v46  ;;  %1168 = vmatmul.msk.f32.vlgmr.msrb.gmra.mxu3 %vm182_vm1, %v1721_v46 }
 0xb5f   :  { %v891_v49 = vpop.f32.mrf.mxu2  ;;  %v911_v50 = vpop.f32.mrf.mxu3 }
 0xb60   :  { %v914_v51 = vadd.f32 %v891_v49, %v112_v47  ;;  %v915_v52 = vadd.f32 %v911_v50, %v156_v48 }
 0xb62   :  { %v1169_v53 = vmul.f32 -1.442695, %v914_v51  ;;  %v1170_v54 = vmul.f32 -1.442695, %v915_v52 }
 0xb64   :  { %1250 = vpow2.f32 %v1169_v53 }
 0xb65   :  { %1252 = vpow2.f32 %v1170_v54 }
 0xb6a   :  { %v1251_v55 = vpop.eup %1250 }
 0xb6b   :  { %v1253_v56 = vpop.eup %1252  ;;  %v922_v58 = vadd.f32 1.0, %v1251_v55 }
 0xb6c   :  { %v923_v59 = vadd.f32 1.0, %v1253_v56 }
 0xb6d   :  { %1254 = vrcp.f32 %v922_v58  ;;  %v935_v22 = vand.u32 2147483648, %v922_v58  ;;  %vm929_vm0 = vweird.f32 %v922_v58  ;;  %v933_v31 = vand.u32 2147483647, %v922_v58 }
 0xb6e   :  { %1256 = vrcp.f32 %v923_v59  ;;  %v950_v11 = vand.u32 2147483648, %v923_v59  ;;  %v948_v13 = vand.u32 2147483647, %v923_v59  ;;  %vm944_vm6 = vweird.f32 %v923_v59 }
 0xb6f   :  { %v936_v34 = vor.u32 1.1754944e-38, %v935_v22  ;;  %vm934_vm11 = vcmp.eq.f32.partialorder %v933_v31, 8.507059e+37 }
 0xb70   :  { %v951_v26 = vor.u32 1.1754944e-38, %v950_v11  ;;  %vm949_vm8 = vcmp.eq.f32.partialorder %v948_v13, 8.507059e+37 }
 0xb73   :  { %v1255_v60 = vpop.eup %1254 }
 0xb74   :  { %v1257_v61 = vpop.eup %1256  ;;  %v925_v6 = vmul.f32 %v1255_v60, %v922_v58  ;;  %vm930_vm5 = vweird.f32 %v1255_v60 }
 0xb75   :  { %v940_v62 = vmul.f32 %v1257_v61, %v923_v59  ;;  %vm945_vm4 = vweird.f32 %v1257_v61  ;;  %vm931_vm9 = vmor %vm929_vm0, %vm930_vm5 }
 0xb76   :  { %v926_v63 = vsub.f32 1.0, %v925_v6  ;;  %vm946_vm7 = vmor %vm944_vm6, %vm945_vm4  ;;  %vm1090_vm6 = vcmask 261120  }
 0xb77   :  { %v941_v7 = vsub.f32 1.0, %v940_v62 }
 0xb78   :  { %v927_v9 = vmul.f32 %v1255_v60, %v926_v63 }
 0xb79   :  { %v942_v12 = vmul.f32 %v1257_v61, %v941_v7 }
 0xb7a   :  { %v928_v28 = vadd.f32 %v1255_v60, %v927_v9 }
 0xb7b   :  { %v943_v30 = vadd.f32 %v1257_v61, %v942_v12 }
 0xb7c   :  { %v932_v23 = vsel %vm931_vm9, %v1255_v60, %v928_v28 }
 0xb7d   :  { %v947_v4 = vsel %vm946_vm7, %v1257_v61, %v943_v30  ;;  %v937_v1 = vsel %vm934_vm11, %v936_v34, %v932_v23  ;;  %vm1093_vm7 = vcmask 785408  }
 0xb7e   :  { %v952_v32 = vsel %vm949_vm8, %v951_v26, %v947_v4  ;;  %v956_v16 = vmul.f32 %v937_v1, %v866_v43 }
 0xb7f   :  { %v954_v5 = vmul.f32 2.0, %v952_v32 }
 0xb81   :  { %v1171_v0 = vadd.f32 -1.0, %v954_v5 }
 0xb83   :  { %v957_v15 = vmul.f32 %v1171_v0, %v937_v1 }
 0xb85   :  { %959 = vrot.lane.b32.xlu2 %v957_v15, %s1270_s25 }
 0xb8d   :  { %1076 = vrot.lane.b32.xlu2 %v1562_v29, %s1271_s0  ;;  %v115_v29 = vadd.f32 %v1690_v8, %v1514_v24 }
 0xbdf   :  { %v960_v18 = vpop.permute.xlu2 %959 }
 0xbe0   :  { %v962_v19 = vadd.f32 %v960_v18, %v956_v16 }
 0xbe2   :  { %1258 = vtanh.f32 %v962_v19 }
 0xbe7   :  { %v1077_v12 = vpop.permute.xlu2 %1076 }
 0xbe8   :  { %v1259_v20 = vpop.eup %1258  ;;  %v1091_v28 = vsel %vm1090_vm6, %v1077_v12, %v1602_v17 }
 0xbe9   :  { %v964_v2 = vmul.f32 %v1259_v20, %v952_v32 }
 0xbeb   :  { %1087 = vrot.lane.b32.xlu2 %v964_v2, %s1272_s20  ;;  %966 = vrot.lane.b32.xlu0 %v964_v2, %s1270_s25 }
 0xbf3   :  { %1083 = vrot.lane.b32.xlu0 %v1709_v57, %s1271_s0 }
 0xbfb   :  { %1062 = vrot.lane.b32.xlu0 %v962_v19, %s1270_s25 }
 0xc45   :  { %v1088_v4 = vpop.permute.xlu2 %1087 }
 0xc5d   :  { %v1737_v21 = vpop.permute.xlu0 %966 }
 0xc5e   :  { %1172 = vmatmul.msk.f32.vlgmr.msrb.gmra.mxu0 %vm182_vm1, %v1737_v21  ;;  %1173 = vmatmul.msk.f32.vlgmr.msrb.gmra.mxu1 %vm182_vm1, %v1737_v21 }
 0xc65   :  { %v1084_v13 = vpop.permute.xlu0 %1083 }
 0xc66   :  { %v1095_v30 = vsel %vm1090_vm6, %v1084_v13, %v1721_v46 }
 0xc67   :  { %v1096_v23 = vsel %vm182_vm1, %v1095_v30, %v1088_v4 }
 0xcdb   :  { %v987_v3 = vpop.f32.mrf.mxu0  ;;  %v1007_v36 = vpop.f32.mrf.mxu1 }
 0xcdc   :  { %v1010_v37 = vadd.f32 %v987_v3, %v115_v29  ;;  %v1011_v57 = vadd.f32 %v1007_v36, %v159_v35 }
 0xcde   :  { %v1174_v38 = vmul.f32 -1.442695, %v1010_v37  ;;  %v1175_v39 = vmul.f32 -1.442695, %v1011_v57 }
 0xce0   :  { %1260 = vpow2.f32 %v1174_v38 }
 0xce1   :  { %1262 = vpow2.f32 %v1175_v39 }
 0xce6   :  { %v1261_v40 = vpop.eup %1260 }
 0xce7   :  { %v1263_v41 = vpop.eup %1262  ;;  %v1018_v42 = vadd.f32 1.0, %v1261_v40 }
 0xce8   :  { %v1019_v43 = vadd.f32 1.0, %v1263_v41 }
 0xce9   :  { %1264 = vrcp.f32 %v1018_v42  ;;  %v1031_v53 = vand.u32 2147483648, %v1018_v42  ;;  %vm1025_vm2 = vweird.f32 %v1018_v42  ;;  %v1029_v55 = vand.u32 2147483647, %v1018_v42 }
 0xcea   :  { %1266 = vrcp.f32 %v1019_v43  ;;  %v1046_v48 = vand.u32 2147483648, %v1019_v43  ;;  %v1044_v50 = vand.u32 2147483647, %v1019_v43  ;;  %vm1040_vm14 = vweird.f32 %v1019_v43 }
 0xceb   :  { %v1032_v61 = vor.u32 1.1754944e-38, %v1031_v53  ;;  %vm1030_vm5 = vcmp.eq.f32.partialorder %v1029_v55, 8.507059e+37 }
 0xcec   :  { %v1047_v54 = vor.u32 1.1754944e-38, %v1046_v48  ;;  %vm1045_vm3 = vcmp.eq.f32.partialorder %v1044_v50, 8.507059e+37 }
 0xcef   :  { %v1265_v44 = vpop.eup %1264 }
 0xcf0   :  { %v1267_v45 = vpop.eup %1266  ;;  %v1021_v24 = vmul.f32 %v1265_v44, %v1018_v42  ;;  %vm1026_vm13 = vweird.f32 %v1265_v44 }
 0xcf1   :  { %v1036_v8 = vmul.f32 %v1267_v45, %v1019_v43  ;;  %vm1041_vm12 = vweird.f32 %v1267_v45  ;;  %vm1027_vm4 = vmor %vm1025_vm2, %vm1026_vm13 }
 0xcf2   :  { %v1022_v47 = vsub.f32 1.0, %v1021_v24  ;;  %vm1042_vm15 = vmor %vm1040_vm14, %vm1041_vm12 }
 0xcf3   :  { %v1037_v25 = vsub.f32 1.0, %v1036_v8 }
 0xcf4   :  { %v1023_v10 = vmul.f32 %v1265_v44, %v1022_v47 }
 0xcf5   :  { %v1038_v49 = vmul.f32 %v1267_v45, %v1037_v25 }
 0xcf6   :  { %v1024_v51 = vadd.f32 %v1265_v44, %v1023_v10 }
 0xcf7   :  { %v1039_v52 = vadd.f32 %v1267_v45, %v1038_v49 }
 0xcf8   :  { %v1028_v59 = vsel %vm1027_vm4, %v1265_v44, %v1024_v51 }
 0xcf9   :  { %v1043_v56 = vsel %vm1042_vm15, %v1267_v45, %v1039_v52  ;;  %v1033_v62 = vsel %vm1030_vm5, %v1032_v61, %v1028_v59 }
 0xcfa   :  { %v1048_v58 = vsel %vm1045_vm3, %v1047_v54, %v1043_v56  ;;  %v1052_v7 = vmul.f32 %v1033_v62, %v962_v19 }
 0xcfb   :  { %v1050_v60 = vmul.f32 2.0, %v1048_v58 }
 0xcfd   :  { %v1176_v6 = vadd.f32 -1.0, %v1050_v60 }
 0xcff   :  { %v1053_v63 = vmul.f32 %v1176_v6, %v1033_v62 }
 0xd01   :  { %1055 = vrot.lane.b32.xlu1 %v1053_v63, %s1270_s25 }
 0xd09   :  { %1080 = vrot.lane.b32.xlu1 %v1651_v33, %s1272_s20 }
 0xd73   :  { %v1056_v9 = vpop.permute.xlu1 %1055 }
 0xd74   :  { %v1058_v11 = vadd.f32 %v1056_v9, %v1052_v7 }
 0xd76   :  { %1268 = vtanh.f32 %v1058_v11  ;;  %1066 = vrot.lane.b32.xlu1 %v1058_v11, %s1270_s25 }
 0xd7b   :  { %v1081_v22 = vpop.permute.xlu1 %1080 }
 0xd7c   :  { %v1269_v26 = vpop.eup %1268  ;;  %v1092_v31 = vsel %vm182_vm1, %v1091_v28, %v1081_v22 }
 0xd7d   :  { %v1094_v33 = vsel %vm1093_vm7, %v1092_v31, %v1698_v14  ;;  %v1060_v32 = vmul.f32 %v1269_v26, %v1048_v58  ;;  %v1063_v14 = vpop.permute.xlu0 %1062 }
 0xd7e   :  { %1098 = vst [vmem:[%s1782_s6] sm:$0xff] %v1094_v33 }
 0xd7f   :  { %1072 = vrot.lane.b32.xlu2 %v1060_v32, %s1270_s25  ;;  %v1097_v5 = vsel %vm1093_vm7, %v1096_v23, %v1060_v32 }
 0xd80   :  { %1099 = vst [vmem:[%s1782_s6 + $0x8] sm:$0xff] %v1097_v5 }
 0xdd9   :  { %v1073_v17 = vpop.permute.xlu2 %1072 }
 0xdda   :  { %v1075_v46 = vsel %vm181_vm10, %v1737_v21, %v1073_v17 }
 0xddb   :  { %1100 = vst.msk [vmem:[%s1783_s7] sm:$0xff] %vm182_vm1, %v1075_v46 }
 0xde8   :  { %v1067_v34 = vpop.permute.xlu1 %1066 }
 0xde9   :  { %v1069_v0 = vsel %vm181_vm10, %v1063_v14, %v1067_v34 }
 0xdea   :  { %1101 = vst.msk [vmem:[%s1784_s8] sm:$0xff] %vm182_vm1, %v1069_v0 }

</bundles_post_ra>
